<compile_context>
chip_gen: v7x
topology: tpu7x:2x2x1
jax: 0.10.0
libtpu: 0.0.40
codegen_flags: <defaults>
</compile_context>

<pallas_src>
import functools

import jax
import jax.numpy as jnp
import numpy as np
from jax.experimental import pallas as pl
from jax.experimental.pallas import tpu as pltpu

BN_EPS = 1e-5


def _down_doubleconv_kernel(x_ref, w1_ref, s1_ref, b1_ref, w2_ref, s2_ref, b2_ref,
                            o_ref, hpool_ref, pad1_ref, pad2_ref):
    # x_ref    : (1, H, W, Cin)      one input image (NHWC)
    # w1_ref   : (9, Cin, Cmid)      conv1 weight, tap k = dy*3 + dx
    # s1_ref   : (1, Cmid)           folded BN1 scale
    # b1_ref   : (1, Cmid)           folded BN1 shift (includes conv bias)
    # w2_ref   : (9, Cmid, Cout)     conv2 weight
    # s2_ref, b2_ref : (1, Cout)     folded BN2 scale / shift
    # o_ref    : (1, M, Cout)        M = (H/2)*(W/2) pooled pixels, row-major (ho, wo)
    # hpool_ref: (Ho*W, Cin)         scratch: row-pair max, flattened
    # pad1_ref : (M + 2*PAD, Cin)    scratch: zero-padded flat pooled activations
    # pad2_ref : (M + 2*PAD, Cmid)   scratch: zero-padded flat conv1 output
    H, W, Cin = x_ref.shape[1], x_ref.shape[2], x_ref.shape[3]
    Ho, Wo = H // 2, W // 2
    M = Ho * Wo
    PAD = (pad1_ref.shape[0] - M) // 2  # >= Wo + 1, multiple of 8

    # ---------------- fused MaxPool2d(2, 2) ----------------
    x = x_ref[0]                                          # (H, W, Cin)
    xr = x.reshape(Ho, 2, W, Cin)                         # split leading dim only
    rowmax = jnp.maximum(xr[:, 0, :, :], xr[:, 1, :, :])  # (Ho, W, Cin)
    hpool_ref[...] = rowmax.reshape(Ho * W, Cin)
    # column-pair max via sublane-strided reads; result rows are (ho, wo) row-major.
    even = hpool_ref[pl.ds(0, M, stride=2), :]
    odd = hpool_ref[pl.ds(1, M, stride=2), :]
    pooled = jnp.maximum(even, odd)                       # (M, Cin)

    # Column masks for the left/right taps (zero padding at the W borders).
    # The H borders are handled by the zero rows of the staging buffers.
    c_idx = jax.lax.broadcasted_iota(jnp.int32, (M, 1), 0) % Wo
    m_left = (c_idx >= 1).astype(jnp.float32)             # valid source col for dx == 0
    m_right = (c_idx <= Wo - 2).astype(jnp.float32)       # valid source col for dx == 2

    def conv3x3_bn_relu(src_ref, w_ref, s_ref, b_ref):
        # src_ref holds the zero-padded flat input; taps are offset reads, the 3x3
        # reduction is accumulated in float32, finished with folded BN + ReLU.
        cout = w_ref.shape[2]
        acc = jnp.zeros((M, cout), jnp.float32)
        for dy in range(3):
            for dx in range(3):
                off = PAD + (dy - 1) * Wo + (dx - 1)
                tap = src_ref[pl.ds(off, M), :]
                if dx == 0:
                    tap = tap * m_left
                elif dx == 2:
                    tap = tap * m_right
                acc = acc + jnp.dot(tap, w_ref[dy * 3 + dx],
                                    preferred_element_type=jnp.float32)
        return jnp.maximum(acc * s_ref[...] + b_ref[...], 0.0)

    # ---------- conv1 + BN1 + ReLU (intermediate stays in VMEM) ----------
    pad1_ref[...] = jnp.zeros_like(pad1_ref)
    pad1_ref[pl.ds(PAD, M), :] = pooled
    y1 = conv3x3_bn_relu(pad1_ref, w1_ref, s1_ref, b1_ref)   # (M, Cmid) float32

    # ---------- conv2 + BN2 + ReLU ----------
    pad2_ref[...] = jnp.zeros_like(pad2_ref)
    pad2_ref[pl.ds(PAD, M), :] = y1
    y2 = conv3x3_bn_relu(pad2_ref, w2_ref, s2_ref, b2_ref)   # (M, Cout) float32

    o_ref[0] = y2.astype(o_ref.dtype)


def _fold_bn(w_oihw, b, gamma, beta, mean, var):
    """Tap-major conv weight + per-channel (scale, shift) folding conv bias + eval BN."""
    cout, cin = w_oihw.shape[0], w_oihw.shape[1]
    w_taps = jnp.transpose(w_oihw, (2, 3, 1, 0)).reshape(9, cin, cout)  # k = dy*3 + dx
    scale = gamma / jnp.sqrt(var + BN_EPS)
    shift = beta + scale * (b - mean)
    return w_taps, scale.reshape(1, cout), shift.reshape(1, cout)


def down_forward(params, x_nchw):
    """Matches Down.forward: MaxPool2d(2,2) -> DoubleConv. NCHW in/out."""
    x = jnp.transpose(x_nchw, (0, 2, 3, 1))               # -> NHWC
    N, H, W, Cin = x.shape
    Ho, Wo = H // 2, W // 2
    M = Ho * Wo

    w1, s1, b1 = _fold_bn(params["w1"], params["b1"], params["g1"],
                          params["beta1"], params["m1"], params["v1"])
    w2, s2, b2 = _fold_bn(params["w2"], params["b2"], params["g2"],
                          params["beta2"], params["m2"], params["v2"])
    Cmid, Cout = w1.shape[2], w2.shape[2]

    pad = ((Wo + 1 + 7) // 8) * 8                         # halo rows (8-aligned)

    out = pl.pallas_call(
        _down_doubleconv_kernel,
        out_shape=jax.ShapeDtypeStruct((N, M, Cout), x.dtype),
        grid=(N,),
        in_specs=[
            pl.BlockSpec((1, H, W, Cin), lambda n: (n, 0, 0, 0)),
            pl.BlockSpec((9, Cin, Cmid), lambda n: (0, 0, 0)),
            pl.BlockSpec((1, Cmid), lambda n: (0, 0)),
            pl.BlockSpec((1, Cmid), lambda n: (0, 0)),
            pl.BlockSpec((9, Cmid, Cout), lambda n: (0, 0, 0)),
            pl.BlockSpec((1, Cout), lambda n: (0, 0)),
            pl.BlockSpec((1, Cout), lambda n: (0, 0)),
        ],
        out_specs=pl.BlockSpec((1, M, Cout), lambda n: (n, 0, 0)),
        scratch_shapes=[
            pltpu.VMEM((Ho * W, Cin), jnp.float32),
            pltpu.VMEM((M + 2 * pad, Cin), jnp.float32),
            pltpu.VMEM((M + 2 * pad, Cmid), jnp.float32),
        ],
        compiler_params=pltpu.CompilerParams(dimension_semantics=("parallel",)),
    )(x, w1, s1, b1, w2, s2, b2)

    y = out.reshape(N, Ho, Wo, Cout)
    return jnp.transpose(y, (0, 3, 1, 2))                 # -> NCHW


# ---------------------------------------------------------------------------
# Parameters (deterministic, synthetic) for Down(in_ch, out_ch).
# ---------------------------------------------------------------------------
def init_params(key, in_ch, out_ch):
    ks = jax.random.split(key, 12)
    rnd = lambda k, s: 0.1 * jax.random.normal(k, s, jnp.float32)
    return {
        # Conv1: OIHW + BN1 (eval-mode stats)
        "w1": rnd(ks[0], (out_ch, in_ch, 3, 3)),
        "b1": rnd(ks[1], (out_ch,)),
        "g1": 1.0 + rnd(ks[2], (out_ch,)),
        "beta1": rnd(ks[3], (out_ch,)),
        "m1": rnd(ks[4], (out_ch,)),
        "v1": jax.random.uniform(ks[5], (out_ch,), jnp.float32, 0.5, 1.5),
        # Conv2: OIHW + BN2
        "w2": rnd(ks[6], (out_ch, out_ch, 3, 3)),
        "b2": rnd(ks[7], (out_ch,)),
        "g2": 1.0 + rnd(ks[8], (out_ch,)),
        "beta2": rnd(ks[9], (out_ch,)),
        "m2": rnd(ks[10], (out_ch,)),
        "v2": jax.random.uniform(ks[11], (out_ch,), jnp.float32, 0.5, 1.5),
    }


# ---------------------------------------------------------------------------
# Pure-JAX reference (independent code path) for a correctness check.
# ---------------------------------------------------------------------------
def ref_forward(params, x_nchw):
    x = jnp.transpose(x_nchw, (0, 2, 3, 1))
    x = jax.lax.reduce_window(x, -jnp.inf, jax.lax.max,
                              (1, 2, 2, 1), (1, 2, 2, 1), "VALID")

    def block(x, w_oihw, b, g, beta, m, v):
        w_hwio = jnp.transpose(w_oihw, (2, 3, 1, 0))
        y = jax.lax.conv_general_dilated(
            x, w_hwio, (1, 1), "SAME",
            dimension_numbers=("NHWC", "HWIO", "NHWC")) + b
        y = (y - m) / jnp.sqrt(v + BN_EPS) * g + beta
        return jnp.maximum(y, 0.0)

    y = block(x, params["w1"], params["b1"], params["g1"], params["beta1"],
              params["m1"], params["v1"])
    y = block(y, params["w2"], params["b2"], params["g2"], params["beta2"],
              params["m2"], params["v2"])
    return jnp.transpose(y, (0, 3, 1, 2))


if __name__ == "__main__":
    in_ch, out_ch = 4, 8          # Down(4, 8)
    N, H, W = 2, 16, 16           # input 16x16 -> pooled 8x8

    key = jax.random.PRNGKey(0)
    kx, kp = jax.random.split(key)
    x = jax.random.normal(kx, (N, in_ch, H, W), jnp.float32)   # (2, 4, 16, 16)
    params = init_params(kp, in_ch, out_ch)

    out = jax.jit(functools.partial(down_forward, params))(x)
    out = jax.block_until_ready(out)
    assert out.shape == (N, out_ch, H // 2, W // 2)

    ref = ref_forward(params, x)
    np.testing.assert_allclose(np.asarray(out), np.asarray(ref), rtol=1e-4, atol=1e-4)

    print("KERNEL_OK")
</pallas_src>

<mosaic_0001>
module attributes {stable_mosaic.version = 11 : i64} {
  func.func @_down_doubleconv_kernel(%arg0: i32, %arg1: memref<1x16x16x4xf32, #tpu.memory_space<vmem>>, %arg2: memref<9x4x8xf32, #tpu.memory_space<vmem>>, %arg3: memref<1x8xf32, #tpu.memory_space<vmem>>, %arg4: memref<1x8xf32, #tpu.memory_space<vmem>>, %arg5: memref<9x8x8xf32, #tpu.memory_space<vmem>>, %arg6: memref<1x8xf32, #tpu.memory_space<vmem>>, %arg7: memref<1x8xf32, #tpu.memory_space<vmem>>, %arg8: memref<1x64x8xf32, #tpu.memory_space<vmem>>, %arg9: memref<128x4xf32, #tpu.memory_space<vmem>>, %arg10: memref<96x4xf32, #tpu.memory_space<vmem>>, %arg11: memref<96x8xf32, #tpu.memory_space<vmem>>) attributes {dimension_semantics = [#tpu.dimension_semantics<parallel>], iteration_bounds = array<i64: 2>, scalar_prefetch = 0 : i64, scratch_operands = 3 : i64, tpu.core_type = #tpu.core_type<tc>, window_params = [{transform_indices = @transform_0, window_bounds = array<i64: 1, 16, 16, 4>}, {pipeline_mode = #tpu.pipeline_mode<synchronous>, transform_indices = @transform_1, window_bounds = array<i64: 9, 4, 8>}, {pipeline_mode = #tpu.pipeline_mode<synchronous>, transform_indices = @transform_2, window_bounds = array<i64: 1, 8>}, {pipeline_mode = #tpu.pipeline_mode<synchronous>, transform_indices = @transform_3, window_bounds = array<i64: 1, 8>}, {pipeline_mode = #tpu.pipeline_mode<synchronous>, transform_indices = @transform_4, window_bounds = array<i64: 9, 8, 8>}, {pipeline_mode = #tpu.pipeline_mode<synchronous>, transform_indices = @transform_5, window_bounds = array<i64: 1, 8>}, {pipeline_mode = #tpu.pipeline_mode<synchronous>, transform_indices = @transform_6, window_bounds = array<i64: 1, 8>}, {transform_indices = @transform_7, window_bounds = array<i64: 1, 64, 8>}]} {
    %c0 = arith.constant 0 : index
    %c0_0 = arith.constant 0 : index
    %c0_1 = arith.constant 0 : index
    %c0_2 = arith.constant 0 : index
    %0 = vector.load %arg1[%c0, %c0_0, %c0_1, %c0_2] : memref<1x16x16x4xf32, #tpu.memory_space<vmem>>, vector<1x16x16x4xf32>
    %1 = vector.shape_cast %0 : vector<1x16x16x4xf32> to vector<16x16x4xf32>
    %2 = vector.shape_cast %1 : vector<16x16x4xf32> to vector<8x2x16x4xf32>
    %3 = vector.extract_strided_slice %2 {offsets = [0, 0, 0, 0], sizes = [8, 1, 16, 4], strides = [1, 1, 1, 1]} : vector<8x2x16x4xf32> to vector<8x1x16x4xf32>
    %4 = vector.shape_cast %3 : vector<8x1x16x4xf32> to vector<8x16x4xf32>
    %5 = vector.extract_strided_slice %2 {offsets = [0, 1, 0, 0], sizes = [8, 1, 16, 4], strides = [1, 1, 1, 1]} : vector<8x2x16x4xf32> to vector<8x1x16x4xf32>
    %6 = vector.shape_cast %5 : vector<8x1x16x4xf32> to vector<8x16x4xf32>
    %7 = arith.maximumf %4, %6 : vector<8x16x4xf32>
    %8 = vector.shape_cast %7 : vector<8x16x4xf32> to vector<128x4xf32>
    %c0_3 = arith.constant 0 : index
    %c0_4 = arith.constant 0 : index
    %9 = vector.load %arg9[%c0_3, %c0_4] : memref<128x4xf32, #tpu.memory_space<vmem>>, vector<128x4xf32>
    tpu.vector_store %arg9[%c0_3, %c0_4], %8 {strides = array<i32>} : memref<128x4xf32, #tpu.memory_space<vmem>>, vector<128x4xf32>,
    %c0_5 = arith.constant 0 : index
    %c0_6 = arith.constant 0 : index
    %10 = tpu.strided_load %arg9[%c0_5, %c0_6] {strides = array<i32: 2, 1>} : memref<128x4xf32, #tpu.memory_space<vmem>>, vector<64x4xf32>
    %c1 = arith.constant 1 : index
    %c0_7 = arith.constant 0 : index
    %11 = tpu.strided_load %arg9[%c1, %c0_7] {strides = array<i32: 2, 1>} : memref<128x4xf32, #tpu.memory_space<vmem>>, vector<64x4xf32>
    %12 = arith.maximumf %10, %11 : vector<64x4xf32>
    %13 = tpu.iota {dimensions = array<i32: 0>} : vector<64x1xi32>
    %c8_i32 = arith.constant 8 : i32
    %c0_i32 = arith.constant 0 : i32
    %14 = arith.cmpi eq, %c8_i32, %c0_i32 : i32
    %c1_i32 = arith.constant 1 : i32
    %15 = arith.select %14, %c1_i32, %c8_i32 : i32
    %16 = vector.broadcast %15 : i32 to vector<64x1xi32>
    %17 = arith.remsi %13, %16 : vector<64x1xi32>
    %c0_i32_8 = arith.constant 0 : i32
    %18 = vector.broadcast %c0_i32_8 : i32 to vector<64x1xi32>
    %19 = arith.cmpi ne, %17, %18 : vector<64x1xi32>
    %c0_i32_9 = arith.constant 0 : i32
    %20 = vector.broadcast %c0_i32_9 : i32 to vector<64x1xi32>
    %21 = arith.cmpi slt, %17, %20 : vector<64x1xi32>
    %c0_i32_10 = arith.constant 0 : i32
    %22 = arith.cmpi slt, %15, %c0_i32_10 : i32
    %23 = vector.broadcast %22 : i1 to vector<64x1xi1>
    %24 = vector.broadcast %23 : vector<64x1xi1> to vector<64x1xi1>
    %25 = arith.xori %21, %24 : vector<64x1xi1>
    %26 = arith.andi %25, %19 : vector<64x1xi1>
    %27 = vector.broadcast %15 : i32 to vector<64x1xi32>
    %28 = arith.addi %17, %27 : vector<64x1xi32>
    %29 = arith.select %26, %28, %17 : vector<64x1xi1>, vector<64x1xi32>
    %c1_i32_11 = arith.constant 1 : i32
    %30 = vector.broadcast %c1_i32_11 : i32 to vector<64x1xi32>
    %31 = arith.cmpi sge, %29, %30 : vector<64x1xi32>
    %32 = arith.extui %31 : vector<64x1xi1> to vector<64x1xi32>
    %33 = arith.sitofp %32 : vector<64x1xi32> to vector<64x1xf32>
    %c6_i32 = arith.constant 6 : i32
    %34 = vector.broadcast %c6_i32 : i32 to vector<64x1xi32>
    %35 = arith.cmpi sle, %29, %34 : vector<64x1xi32>
    %36 = arith.extui %35 : vector<64x1xi1> to vector<64x1xi32>
    %37 = arith.sitofp %36 : vector<64x1xi32> to vector<64x1xf32>
    %cst = arith.constant 0.000000e+00 : f32
    %38 = vector.broadcast %cst : f32 to vector<96x4xf32>
    %c0_12 = arith.constant 0 : index
    %c0_13 = arith.constant 0 : index
    %39 = vector.load %arg10[%c0_12, %c0_13] : memref<96x4xf32, #tpu.memory_space<vmem>>, vector<96x4xf32>
    tpu.vector_store %arg10[%c0_12, %c0_13], %38 {strides = array<i32>} : memref<96x4xf32, #tpu.memory_space<vmem>>, vector<96x4xf32>,
    %c16 = arith.constant 16 : index
    %c0_14 = arith.constant 0 : index
    %40 = vector.load %arg10[%c16, %c0_14] : memref<96x4xf32, #tpu.memory_space<vmem>>, vector<64x4xf32>
    tpu.vector_store %arg10[%c16, %c0_14], %12 {strides = array<i32>} : memref<96x4xf32, #tpu.memory_space<vmem>>, vector<64x4xf32>,
    %cst_15 = arith.constant 0.000000e+00 : f32
    %41 = vector.broadcast %cst_15 : f32 to vector<64x8xf32>
    %c7 = arith.constant 7 : index
    %c0_16 = arith.constant 0 : index
    %42 = vector.load %arg10[%c7, %c0_16] : memref<96x4xf32, #tpu.memory_space<vmem>>, vector<64x4xf32>
    %43 = vector.broadcast %33 : vector<64x1xf32> to vector<64x4xf32>
    %44 = arith.mulf %42, %43 : vector<64x4xf32>
    %c0_17 = arith.constant 0 : index
    %c0_18 = arith.constant 0 : index
    %c0_19 = arith.constant 0 : index
    %45 = vector.load %arg2[%c0_17, %c0_18, %c0_19] : memref<9x4x8xf32, #tpu.memory_space<vmem>>, vector<1x4x8xf32>
    %46 = vector.shape_cast %45 : vector<1x4x8xf32> to vector<4x8xf32>
    %cst_20 = arith.constant dense<0.000000e+00> : vector<64x8xf32>
    %47 = tpu.matmul %44, %46, %cst_20 {dimension_numbers = #tpu.dot_dimension_numbers<[1], [0], [0], [1], [0, 0, 1, 1], [], []>} : vector<64x4xf32>, vector<4x8xf32>, vector<64x8xf32> -> vector<64x8xf32>
    %48 = arith.addf %41, %47 : vector<64x8xf32>
    %c8 = arith.constant 8 : index
    %c0_21 = arith.constant 0 : index
    %49 = vector.load %arg10[%c8, %c0_21] : memref<96x4xf32, #tpu.memory_space<vmem>>, vector<64x4xf32>
    %c1_22 = arith.constant 1 : index
    %c0_23 = arith.constant 0 : index
    %c0_24 = arith.constant 0 : index
    %50 = vector.load %arg2[%c1_22, %c0_23, %c0_24] : memref<9x4x8xf32, #tpu.memory_space<vmem>>, vector<1x4x8xf32>
    %51 = vector.shape_cast %50 : vector<1x4x8xf32> to vector<4x8xf32>
    %cst_25 = arith.constant dense<0.000000e+00> : vector<64x8xf32>
    %52 = tpu.matmul %49, %51, %cst_25 {dimension_numbers = #tpu.dot_dimension_numbers<[1], [0], [0], [1], [0, 0, 1, 1], [], []>} : vector<64x4xf32>, vector<4x8xf32>, vector<64x8xf32> -> vector<64x8xf32>
    %53 = arith.addf %48, %52 : vector<64x8xf32>
    %c9 = arith.constant 9 : index
    %c0_26 = arith.constant 0 : index
    %54 = vector.load %arg10[%c9, %c0_26] : memref<96x4xf32, #tpu.memory_space<vmem>>, vector<64x4xf32>
    %55 = vector.broadcast %37 : vector<64x1xf32> to vector<64x4xf32>
    %56 = arith.mulf %54, %55 : vector<64x4xf32>
    %c2 = arith.constant 2 : index
    %c0_27 = arith.constant 0 : index
    %c0_28 = arith.constant 0 : index
    %57 = vector.load %arg2[%c2, %c0_27, %c0_28] : memref<9x4x8xf32, #tpu.memory_space<vmem>>, vector<1x4x8xf32>
    %58 = vector.shape_cast %57 : vector<1x4x8xf32> to vector<4x8xf32>
    %cst_29 = arith.constant dense<0.000000e+00> : vector<64x8xf32>
    %59 = tpu.matmul %56, %58, %cst_29 {dimension_numbers = #tpu.dot_dimension_numbers<[1], [0], [0], [1], [0, 0, 1, 1], [], []>} : vector<64x4xf32>, vector<4x8xf32>, vector<64x8xf32> -> vector<64x8xf32>
    %60 = arith.addf %53, %59 : vector<64x8xf32>
    %c15 = arith.constant 15 : index
    %c0_30 = arith.constant 0 : index
    %61 = vector.load %arg10[%c15, %c0_30] : memref<96x4xf32, #tpu.memory_space<vmem>>, vector<64x4xf32>
    %62 = vector.broadcast %33 : vector<64x1xf32> to vector<64x4xf32>
    %63 = arith.mulf %61, %62 : vector<64x4xf32>
    %c3 = arith.constant 3 : index
    %c0_31 = arith.constant 0 : index
    %c0_32 = arith.constant 0 : index
    %64 = vector.load %arg2[%c3, %c0_31, %c0_32] : memref<9x4x8xf32, #tpu.memory_space<vmem>>, vector<1x4x8xf32>
    %65 = vector.shape_cast %64 : vector<1x4x8xf32> to vector<4x8xf32>
    %cst_33 = arith.constant dense<0.000000e+00> : vector<64x8xf32>
    %66 = tpu.matmul %63, %65, %cst_33 {dimension_numbers = #tpu.dot_dimension_numbers<[1], [0], [0], [1], [0, 0, 1, 1], [], []>} : vector<64x4xf32>, vector<4x8xf32>, vector<64x8xf32> -> vector<64x8xf32>
    %67 = arith.addf %60, %66 : vector<64x8xf32>
    %c16_34 = arith.constant 16 : index
    %c0_35 = arith.constant 0 : index
    %68 = vector.load %arg10[%c16_34, %c0_35] : memref<96x4xf32, #tpu.memory_space<vmem>>, vector<64x4xf32>
    %c4 = arith.constant 4 : index
    %c0_36 = arith.constant 0 : index
    %c0_37 = arith.constant 0 : index
    %69 = vector.load %arg2[%c4, %c0_36, %c0_37] : memref<9x4x8xf32, #tpu.memory_space<vmem>>, vector<1x4x8xf32>
    %70 = vector.shape_cast %69 : vector<1x4x8xf32> to vector<4x8xf32>
    %cst_38 = arith.constant dense<0.000000e+00> : vector<64x8xf32>
    %71 = tpu.matmul %68, %70, %cst_38 {dimension_numbers = #tpu.dot_dimension_numbers<[1], [0], [0], [1], [0, 0, 1, 1], [], []>} : vector<64x4xf32>, vector<4x8xf32>, vector<64x8xf32> -> vector<64x8xf32>
    %72 = arith.addf %67, %71 : vector<64x8xf32>
    %c17 = arith.constant 17 : index
    %c0_39 = arith.constant 0 : index
    %73 = vector.load %arg10[%c17, %c0_39] : memref<96x4xf32, #tpu.memory_space<vmem>>, vector<64x4xf32>
    %74 = vector.broadcast %37 : vector<64x1xf32> to vector<64x4xf32>
    %75 = arith.mulf %73, %74 : vector<64x4xf32>
    %c5 = arith.constant 5 : index
    %c0_40 = arith.constant 0 : index
    %c0_41 = arith.constant 0 : index
    %76 = vector.load %arg2[%c5, %c0_40, %c0_41] : memref<9x4x8xf32, #tpu.memory_space<vmem>>, vector<1x4x8xf32>
    %77 = vector.shape_cast %76 : vector<1x4x8xf32> to vector<4x8xf32>
    %cst_42 = arith.constant dense<0.000000e+00> : vector<64x8xf32>
    %78 = tpu.matmul %75, %77, %cst_42 {dimension_numbers = #tpu.dot_dimension_numbers<[1], [0], [0], [1], [0, 0, 1, 1], [], []>} : vector<64x4xf32>, vector<4x8xf32>, vector<64x8xf32> -> vector<64x8xf32>
    %79 = arith.addf %72, %78 : vector<64x8xf32>
    %c23 = arith.constant 23 : index
    %c0_43 = arith.constant 0 : index
    %80 = vector.load %arg10[%c23, %c0_43] : memref<96x4xf32, #tpu.memory_space<vmem>>, vector<64x4xf32>
    %81 = vector.broadcast %33 : vector<64x1xf32> to vector<64x4xf32>
    %82 = arith.mulf %80, %81 : vector<64x4xf32>
    %c6 = arith.constant 6 : index
    %c0_44 = arith.constant 0 : index
    %c0_45 = arith.constant 0 : index
    %83 = vector.load %arg2[%c6, %c0_44, %c0_45] : memref<9x4x8xf32, #tpu.memory_space<vmem>>, vector<1x4x8xf32>
    %84 = vector.shape_cast %83 : vector<1x4x8xf32> to vector<4x8xf32>
    %cst_46 = arith.constant dense<0.000000e+00> : vector<64x8xf32>
    %85 = tpu.matmul %82, %84, %cst_46 {dimension_numbers = #tpu.dot_dimension_numbers<[1], [0], [0], [1], [0, 0, 1, 1], [], []>} : vector<64x4xf32>, vector<4x8xf32>, vector<64x8xf32> -> vector<64x8xf32>
    %86 = arith.addf %79, %85 : vector<64x8xf32>
    %c24 = arith.constant 24 : index
    %c0_47 = arith.constant 0 : index
    %87 = vector.load %arg10[%c24, %c0_47] : memref<96x4xf32, #tpu.memory_space<vmem>>, vector<64x4xf32>
    %c7_48 = arith.constant 7 : index
    %c0_49 = arith.constant 0 : index
    %c0_50 = arith.constant 0 : index
    %88 = vector.load %arg2[%c7_48, %c0_49, %c0_50] : memref<9x4x8xf32, #tpu.memory_space<vmem>>, vector<1x4x8xf32>
    %89 = vector.shape_cast %88 : vector<1x4x8xf32> to vector<4x8xf32>
    %cst_51 = arith.constant dense<0.000000e+00> : vector<64x8xf32>
    %90 = tpu.matmul %87, %89, %cst_51 {dimension_numbers = #tpu.dot_dimension_numbers<[1], [0], [0], [1], [0, 0, 1, 1], [], []>} : vector<64x4xf32>, vector<4x8xf32>, vector<64x8xf32> -> vector<64x8xf32>
    %91 = arith.addf %86, %90 : vector<64x8xf32>
    %c25 = arith.constant 25 : index
    %c0_52 = arith.constant 0 : index
    %92 = vector.load %arg10[%c25, %c0_52] : memref<96x4xf32, #tpu.memory_space<vmem>>, vector<64x4xf32>
    %93 = vector.broadcast %37 : vector<64x1xf32> to vector<64x4xf32>
    %94 = arith.mulf %92, %93 : vector<64x4xf32>
    %c8_53 = arith.constant 8 : index
    %c0_54 = arith.constant 0 : index
    %c0_55 = arith.constant 0 : index
    %95 = vector.load %arg2[%c8_53, %c0_54, %c0_55] : memref<9x4x8xf32, #tpu.memory_space<vmem>>, vector<1x4x8xf32>
    %96 = vector.shape_cast %95 : vector<1x4x8xf32> to vector<4x8xf32>
    %cst_56 = arith.constant dense<0.000000e+00> : vector<64x8xf32>
    %97 = tpu.matmul %94, %96, %cst_56 {dimension_numbers = #tpu.dot_dimension_numbers<[1], [0], [0], [1], [0, 0, 1, 1], [], []>} : vector<64x4xf32>, vector<4x8xf32>, vector<64x8xf32> -> vector<64x8xf32>
    %98 = arith.addf %91, %97 : vector<64x8xf32>
    %c0_57 = arith.constant 0 : index
    %c0_58 = arith.constant 0 : index
    %99 = vector.load %arg3[%c0_57, %c0_58] : memref<1x8xf32, #tpu.memory_space<vmem>>, vector<1x8xf32>
    %100 = vector.broadcast %99 : vector<1x8xf32> to vector<64x8xf32>
    %101 = arith.mulf %98, %100 : vector<64x8xf32>
    %c0_59 = arith.constant 0 : index
    %c0_60 = arith.constant 0 : index
    %102 = vector.load %arg4[%c0_59, %c0_60] : memref<1x8xf32, #tpu.memory_space<vmem>>, vector<1x8xf32>
    %103 = vector.broadcast %102 : vector<1x8xf32> to vector<64x8xf32>
    %104 = arith.addf %101, %103 : vector<64x8xf32>
    %cst_61 = arith.constant 0.000000e+00 : f32
    %105 = vector.broadcast %cst_61 : f32 to vector<64x8xf32>
    %106 = arith.maximumf %104, %105 : vector<64x8xf32>
    %cst_62 = arith.constant 0.000000e+00 : f32
    %107 = vector.broadcast %cst_62 : f32 to vector<96x8xf32>
    %c0_63 = arith.constant 0 : index
    %c0_64 = arith.constant 0 : index
    %108 = vector.load %arg11[%c0_63, %c0_64] : memref<96x8xf32, #tpu.memory_space<vmem>>, vector<96x8xf32>
    tpu.vector_store %arg11[%c0_63, %c0_64], %107 {strides = array<i32>} : memref<96x8xf32, #tpu.memory_space<vmem>>, vector<96x8xf32>,
    %c16_65 = arith.constant 16 : index
    %c0_66 = arith.constant 0 : index
    %109 = vector.load %arg11[%c16_65, %c0_66] : memref<96x8xf32, #tpu.memory_space<vmem>>, vector<64x8xf32>
    tpu.vector_store %arg11[%c16_65, %c0_66], %106 {strides = array<i32>} : memref<96x8xf32, #tpu.memory_space<vmem>>, vector<64x8xf32>,
    %cst_67 = arith.constant 0.000000e+00 : f32
    %110 = vector.broadcast %cst_67 : f32 to vector<64x8xf32>
    %c7_68 = arith.constant 7 : index
    %c0_69 = arith.constant 0 : index
    %111 = vector.load %arg11[%c7_68, %c0_69] : memref<96x8xf32, #tpu.memory_space<vmem>>, vector<64x8xf32>
    %112 = vector.broadcast %33 : vector<64x1xf32> to vector<64x8xf32>
    %113 = arith.mulf %111, %112 : vector<64x8xf32>
    %c0_70 = arith.constant 0 : index
    %c0_71 = arith.constant 0 : index
    %c0_72 = arith.constant 0 : index
    %114 = vector.load %arg5[%c0_70, %c0_71, %c0_72] : memref<9x8x8xf32, #tpu.memory_space<vmem>>, vector<1x8x8xf32>
    %115 = vector.shape_cast %114 : vector<1x8x8xf32> to vector<8x8xf32>
    %cst_73 = arith.constant dense<0.000000e+00> : vector<64x8xf32>
    %116 = tpu.matmul %113, %115, %cst_73 {dimension_numbers = #tpu.dot_dimension_numbers<[1], [0], [0], [1], [0, 0, 1, 1], [], []>} : vector<64x8xf32>, vector<8x8xf32>, vector<64x8xf32> -> vector<64x8xf32>
    %117 = arith.addf %110, %116 : vector<64x8xf32>
    %c8_74 = arith.constant 8 : index
    %c0_75 = arith.constant 0 : index
    %118 = vector.load %arg11[%c8_74, %c0_75] : memref<96x8xf32, #tpu.memory_space<vmem>>, vector<64x8xf32>
    %c1_76 = arith.constant 1 : index
    %c0_77 = arith.constant 0 : index
    %c0_78 = arith.constant 0 : index
    %119 = vector.load %arg5[%c1_76, %c0_77, %c0_78] : memref<9x8x8xf32, #tpu.memory_space<vmem>>, vector<1x8x8xf32>
    %120 = vector.shape_cast %119 : vector<1x8x8xf32> to vector<8x8xf32>
    %cst_79 = arith.constant dense<0.000000e+00> : vector<64x8xf32>
    %121 = tpu.matmul %118, %120, %cst_79 {dimension_numbers = #tpu.dot_dimension_numbers<[1], [0], [0], [1], [0, 0, 1, 1], [], []>} : vector<64x8xf32>, vector<8x8xf32>, vector<64x8xf32> -> vector<64x8xf32>
    %122 = arith.addf %117, %121 : vector<64x8xf32>
    %c9_80 = arith.constant 9 : index
    %c0_81 = arith.constant 0 : index
    %123 = vector.load %arg11[%c9_80, %c0_81] : memref<96x8xf32, #tpu.memory_space<vmem>>, vector<64x8xf32>
    %124 = vector.broadcast %37 : vector<64x1xf32> to vector<64x8xf32>
    %125 = arith.mulf %123, %124 : vector<64x8xf32>
    %c2_82 = arith.constant 2 : index
    %c0_83 = arith.constant 0 : index
    %c0_84 = arith.constant 0 : index
    %126 = vector.load %arg5[%c2_82, %c0_83, %c0_84] : memref<9x8x8xf32, #tpu.memory_space<vmem>>, vector<1x8x8xf32>
    %127 = vector.shape_cast %126 : vector<1x8x8xf32> to vector<8x8xf32>
    %cst_85 = arith.constant dense<0.000000e+00> : vector<64x8xf32>
    %128 = tpu.matmul %125, %127, %cst_85 {dimension_numbers = #tpu.dot_dimension_numbers<[1], [0], [0], [1], [0, 0, 1, 1], [], []>} : vector<64x8xf32>, vector<8x8xf32>, vector<64x8xf32> -> vector<64x8xf32>
    %129 = arith.addf %122, %128 : vector<64x8xf32>
    %c15_86 = arith.constant 15 : index
    %c0_87 = arith.constant 0 : index
    %130 = vector.load %arg11[%c15_86, %c0_87] : memref<96x8xf32, #tpu.memory_space<vmem>>, vector<64x8xf32>
    %131 = vector.broadcast %33 : vector<64x1xf32> to vector<64x8xf32>
    %132 = arith.mulf %130, %131 : vector<64x8xf32>
    %c3_88 = arith.constant 3 : index
    %c0_89 = arith.constant 0 : index
    %c0_90 = arith.constant 0 : index
    %133 = vector.load %arg5[%c3_88, %c0_89, %c0_90] : memref<9x8x8xf32, #tpu.memory_space<vmem>>, vector<1x8x8xf32>
    %134 = vector.shape_cast %133 : vector<1x8x8xf32> to vector<8x8xf32>
    %cst_91 = arith.constant dense<0.000000e+00> : vector<64x8xf32>
    %135 = tpu.matmul %132, %134, %cst_91 {dimension_numbers = #tpu.dot_dimension_numbers<[1], [0], [0], [1], [0, 0, 1, 1], [], []>} : vector<64x8xf32>, vector<8x8xf32>, vector<64x8xf32> -> vector<64x8xf32>
    %136 = arith.addf %129, %135 : vector<64x8xf32>
    %c16_92 = arith.constant 16 : index
    %c0_93 = arith.constant 0 : index
    %137 = vector.load %arg11[%c16_92, %c0_93] : memref<96x8xf32, #tpu.memory_space<vmem>>, vector<64x8xf32>
    %c4_94 = arith.constant 4 : index
    %c0_95 = arith.constant 0 : index
    %c0_96 = arith.constant 0 : index
    %138 = vector.load %arg5[%c4_94, %c0_95, %c0_96] : memref<9x8x8xf32, #tpu.memory_space<vmem>>, vector<1x8x8xf32>
    %139 = vector.shape_cast %138 : vector<1x8x8xf32> to vector<8x8xf32>
    %cst_97 = arith.constant dense<0.000000e+00> : vector<64x8xf32>
    %140 = tpu.matmul %137, %139, %cst_97 {dimension_numbers = #tpu.dot_dimension_numbers<[1], [0], [0], [1], [0, 0, 1, 1], [], []>} : vector<64x8xf32>, vector<8x8xf32>, vector<64x8xf32> -> vector<64x8xf32>
    %141 = arith.addf %136, %140 : vector<64x8xf32>
    %c17_98 = arith.constant 17 : index
    %c0_99 = arith.constant 0 : index
    %142 = vector.load %arg11[%c17_98, %c0_99] : memref<96x8xf32, #tpu.memory_space<vmem>>, vector<64x8xf32>
    %143 = vector.broadcast %37 : vector<64x1xf32> to vector<64x8xf32>
    %144 = arith.mulf %142, %143 : vector<64x8xf32>
    %c5_100 = arith.constant 5 : index
    %c0_101 = arith.constant 0 : index
    %c0_102 = arith.constant 0 : index
    %145 = vector.load %arg5[%c5_100, %c0_101, %c0_102] : memref<9x8x8xf32, #tpu.memory_space<vmem>>, vector<1x8x8xf32>
    %146 = vector.shape_cast %145 : vector<1x8x8xf32> to vector<8x8xf32>
    %cst_103 = arith.constant dense<0.000000e+00> : vector<64x8xf32>
    %147 = tpu.matmul %144, %146, %cst_103 {dimension_numbers = #tpu.dot_dimension_numbers<[1], [0], [0], [1], [0, 0, 1, 1], [], []>} : vector<64x8xf32>, vector<8x8xf32>, vector<64x8xf32> -> vector<64x8xf32>
    %148 = arith.addf %141, %147 : vector<64x8xf32>
    %c23_104 = arith.constant 23 : index
    %c0_105 = arith.constant 0 : index
    %149 = vector.load %arg11[%c23_104, %c0_105] : memref<96x8xf32, #tpu.memory_space<vmem>>, vector<64x8xf32>
    %150 = vector.broadcast %33 : vector<64x1xf32> to vector<64x8xf32>
    %151 = arith.mulf %149, %150 : vector<64x8xf32>
    %c6_106 = arith.constant 6 : index
    %c0_107 = arith.constant 0 : index
    %c0_108 = arith.constant 0 : index
    %152 = vector.load %arg5[%c6_106, %c0_107, %c0_108] : memref<9x8x8xf32, #tpu.memory_space<vmem>>, vector<1x8x8xf32>
    %153 = vector.shape_cast %152 : vector<1x8x8xf32> to vector<8x8xf32>
    %cst_109 = arith.constant dense<0.000000e+00> : vector<64x8xf32>
    %154 = tpu.matmul %151, %153, %cst_109 {dimension_numbers = #tpu.dot_dimension_numbers<[1], [0], [0], [1], [0, 0, 1, 1], [], []>} : vector<64x8xf32>, vector<8x8xf32>, vector<64x8xf32> -> vector<64x8xf32>
    %155 = arith.addf %148, %154 : vector<64x8xf32>
    %c24_110 = arith.constant 24 : index
    %c0_111 = arith.constant 0 : index
    %156 = vector.load %arg11[%c24_110, %c0_111] : memref<96x8xf32, #tpu.memory_space<vmem>>, vector<64x8xf32>
    %c7_112 = arith.constant 7 : index
    %c0_113 = arith.constant 0 : index
    %c0_114 = arith.constant 0 : index
    %157 = vector.load %arg5[%c7_112, %c0_113, %c0_114] : memref<9x8x8xf32, #tpu.memory_space<vmem>>, vector<1x8x8xf32>
    %158 = vector.shape_cast %157 : vector<1x8x8xf32> to vector<8x8xf32>
    %cst_115 = arith.constant dense<0.000000e+00> : vector<64x8xf32>
    %159 = tpu.matmul %156, %158, %cst_115 {dimension_numbers = #tpu.dot_dimension_numbers<[1], [0], [0], [1], [0, 0, 1, 1], [], []>} : vector<64x8xf32>, vector<8x8xf32>, vector<64x8xf32> -> vector<64x8xf32>
    %160 = arith.addf %155, %159 : vector<64x8xf32>
    %c25_116 = arith.constant 25 : index
    %c0_117 = arith.constant 0 : index
    %161 = vector.load %arg11[%c25_116, %c0_117] : memref<96x8xf32, #tpu.memory_space<vmem>>, vector<64x8xf32>
    %162 = vector.broadcast %37 : vector<64x1xf32> to vector<64x8xf32>
    %163 = arith.mulf %161, %162 : vector<64x8xf32>
    %c8_118 = arith.constant 8 : index
    %c0_119 = arith.constant 0 : index
    %c0_120 = arith.constant 0 : index
    %164 = vector.load %arg5[%c8_118, %c0_119, %c0_120] : memref<9x8x8xf32, #tpu.memory_space<vmem>>, vector<1x8x8xf32>
    %165 = vector.shape_cast %164 : vector<1x8x8xf32> to vector<8x8xf32>
    %cst_121 = arith.constant dense<0.000000e+00> : vector<64x8xf32>
    %166 = tpu.matmul %163, %165, %cst_121 {dimension_numbers = #tpu.dot_dimension_numbers<[1], [0], [0], [1], [0, 0, 1, 1], [], []>} : vector<64x8xf32>, vector<8x8xf32>, vector<64x8xf32> -> vector<64x8xf32>
    %167 = arith.addf %160, %166 : vector<64x8xf32>
    %c0_122 = arith.constant 0 : index
    %c0_123 = arith.constant 0 : index
    %168 = vector.load %arg6[%c0_122, %c0_123] : memref<1x8xf32, #tpu.memory_space<vmem>>, vector<1x8xf32>
    %169 = vector.broadcast %168 : vector<1x8xf32> to vector<64x8xf32>
    %170 = arith.mulf %167, %169 : vector<64x8xf32>
    %c0_124 = arith.constant 0 : index
    %c0_125 = arith.constant 0 : index
    %171 = vector.load %arg7[%c0_124, %c0_125] : memref<1x8xf32, #tpu.memory_space<vmem>>, vector<1x8xf32>
    %172 = vector.broadcast %171 : vector<1x8xf32> to vector<64x8xf32>
    %173 = arith.addf %170, %172 : vector<64x8xf32>
    %cst_126 = arith.constant 0.000000e+00 : f32
    %174 = vector.broadcast %cst_126 : f32 to vector<64x8xf32>
    %175 = arith.maximumf %173, %174 : vector<64x8xf32>
    %c0_127 = arith.constant 0 : index
    %c0_128 = arith.constant 0 : index
    %c0_129 = arith.constant 0 : index
    %176 = vector.load %arg8[%c0_127, %c0_128, %c0_129] : memref<1x64x8xf32, #tpu.memory_space<vmem>>, vector<1x64x8xf32>
    %177 = vector.shape_cast %176 : vector<1x64x8xf32> to vector<64x8xf32>
    %178 = vector.shape_cast %175 : vector<64x8xf32> to vector<1x64x8xf32>
    tpu.vector_store %arg8[%c0_127, %c0_128, %c0_129], %178 {strides = array<i32>} : memref<1x64x8xf32, #tpu.memory_space<vmem>>, vector<1x64x8xf32>,
    return
  }
  func.func @transform_0(%arg0: i32) -> (i32, i32, i32, i32) {
    %c0_i32 = arith.constant 0 : i32
    %c0_i32_0 = arith.constant 0 : i32
    %c0_i32_1 = arith.constant 0 : i32
    %c0_i32_2 = arith.constant 0 : i32
    return %arg0, %c0_i32, %c0_i32_0, %c0_i32_1 : i32, i32, i32, i32
  }
  func.func @transform_1(%arg0: i32) -> (i32, i32, i32) {
    %c0_i32 = arith.constant 0 : i32
    %c0_i32_0 = arith.constant 0 : i32
    %c0_i32_1 = arith.constant 0 : i32
    %c0_i32_2 = arith.constant 0 : i32
    return %c0_i32, %c0_i32_0, %c0_i32_1 : i32, i32, i32
  }
  func.func @transform_2(%arg0: i32) -> (i32, i32) {
    %c0_i32 = arith.constant 0 : i32
    %c0_i32_0 = arith.constant 0 : i32
    %c0_i32_1 = arith.constant 0 : i32
    return %c0_i32, %c0_i32_0 : i32, i32
  }
  func.func @transform_3(%arg0: i32) -> (i32, i32) {
    %c0_i32 = arith.constant 0 : i32
    %c0_i32_0 = arith.constant 0 : i32
    %c0_i32_1 = arith.constant 0 : i32
    return %c0_i32, %c0_i32_0 : i32, i32
  }
  func.func @transform_4(%arg0: i32) -> (i32, i32, i32) {
    %c0_i32 = arith.constant 0 : i32
    %c0_i32_0 = arith.constant 0 : i32
    %c0_i32_1 = arith.constant 0 : i32
    %c0_i32_2 = arith.constant 0 : i32
    return %c0_i32, %c0_i32_0, %c0_i32_1 : i32, i32, i32
  }
  func.func @transform_5(%arg0: i32) -> (i32, i32) {
    %c0_i32 = arith.constant 0 : i32
    %c0_i32_0 = arith.constant 0 : i32
    %c0_i32_1 = arith.constant 0 : i32
    return %c0_i32, %c0_i32_0 : i32, i32
  }
  func.func @transform_6(%arg0: i32) -> (i32, i32) {
    %c0_i32 = arith.constant 0 : i32
    %c0_i32_0 = arith.constant 0 : i32
    %c0_i32_1 = arith.constant 0 : i32
    return %c0_i32, %c0_i32_0 : i32, i32
  }
  func.func @transform_7(%arg0: i32) -> (i32, i32, i32) {
    %c0_i32 = arith.constant 0 : i32
    %c0_i32_0 = arith.constant 0 : i32
    %c0_i32_1 = arith.constant 0 : i32
    return %arg0, %c0_i32, %c0_i32_0 : i32, i32, i32
  }
}

</mosaic_0001>

<bundles_post_ra>
// kernel: down_forward.1
= control target key start
LH: loop header
LB: loop body
LE: loop exit
PB: predicated region body
PF: predicated region fallthrough
CT: control target
= control target key end

     0   :  { %s4254_s24 = smov 0   ;;  %s5024_s0 = inlined_call_operand.vmem [shape: f32[2,16,16,4], index: 0, kind: input, shape index: {}]   ;;  %s5025_s1 = inlined_call_operand.vmem [shape: f32[9,4,8], index: 1, kind: input, shape index: {}]   ;;  %s5026_s2 = inlined_call_operand.vmem [shape: f32[1,8], index: 2, kind: input, shape index: {}]   ;;  %s5027_s3 = inlined_call_operand.vmem [shape: f32[1,8], index: 3, kind: input, shape index: {}]   ;;  %s5028_s4 = inlined_call_operand.vmem [shape: f32[9,8,8], index: 4, kind: input, shape index: {}]   ;;  %s5029_s5 = inlined_call_operand.vmem [shape: f32[1,8], index: 5, kind: input, shape index: {}]   ;;  %s5030_s6 = inlined_call_operand.vmem [shape: f32[1,8], index: 6, kind: input, shape index: {}]   ;;  %s5031_s7 = inlined_call_operand.vmem [shape: f32[2,64,8], index: 7, kind: output, shape index: {}]  }
   0x1 LB: > { %s3452_s25 = sadd.s32 4294967295, %s4211_s24   ;;  %p3456_p0 = scmp.ge.s32.totalorder %s4211_s24, 1  ;;  %s4211_s24 = sphi %s4254_s24, %s17_s24  }
   0x2   : > { %p237_p1 = scmp.lt.s32.totalorder %s4211_s24, 3 }
   0x4   : > { %p238_p2 = pnand %p3456_p0, %p237_p1 }
   0x5   : > { %v3477_v0 = vld [vmem:[%s5025_s1 + $0x4] sm:$0xf] (!%p238_p2)  ;;  %vm607_vm0 = vcmask (!%p238_p2), 1043456   ;;  %vm327_vm1 = vcmask (!%p238_p2), 31744   ;;  %p4265_p3 = scmp.lt.s32.totalorder (!%p238_p2), %s3452_s25, 1  ;;  %v4213_v1 = vmov (!%p238_p2), 0.0   ;;  %v383_v55 = vlaneseq (!%p238_p2) }
   0x6   : > { %241 = sbr.rel (%p238_p2) target bundleno = 753 (0x2f1), region = 48  ;;  %3816 = vmatprep.subr.msk.mxu0 (!%p238_p2), %vm607_vm0, %v3477_v0  ;;  %537 = vst.msk [vmem:[#allocation3 + $0x8] sm:$0xff] (!%p238_p2), %vm327_vm1, %v4213_v1  ;;  %536 = vst.msk [vmem:[#allocation3] sm:$0xff] (!%p238_p2), %vm327_vm1, %v4213_v1  ;;  %v4297_v2 = vld [vmem:[%s5025_s1] sm:$0xf] (!%p238_p2) }
   0x7   : > { %538 = vst.msk [vmem:[#allocation3 + $0x10] sm:$0xff] (!%p238_p2), %vm327_vm1, %v4213_v1  ;;  %539 = vst.msk [vmem:[#allocation3 + $0x18] sm:$0xff] (!%p238_p2), %vm327_vm1, %v4213_v1  ;;  %3817 = vmatpush3.msk.msra.mxu0 (!%p238_p2), %vm607_vm0, %v3477_v0 }
   0x8   : > { %540 = vst.msk [vmem:[#allocation3 + $0x20] sm:$0xff] (!%p238_p2), %vm327_vm1, %v4213_v1  ;;  %541 = vst.msk [vmem:[#allocation3 + $0x28] sm:$0xff] (!%p238_p2), %vm327_vm1, %v4213_v1  ;;  %3830 = vmatprep.subr.msk.mxu0 (!%p238_p2), %vm607_vm0, %v4297_v2 }
   0x9   : > { %542 = vst.msk [vmem:[#allocation3 + $0x30] sm:$0xff] (!%p238_p2), %vm327_vm1, %v4213_v1  ;;  %543 = vst.msk [vmem:[#allocation3 + $0x38] sm:$0xff] (!%p238_p2), %vm327_vm1, %v4213_v1 }
   0xa   : > { %544 = vst.msk [vmem:[#allocation3 + $0x40] sm:$0xff] (!%p238_p2), %vm327_vm1, %v4213_v1  ;;  %545 = vst.msk [vmem:[#allocation3 + $0x48] sm:$0xff] (!%p238_p2), %vm327_vm1, %v4213_v1 }
   0xb   : > { %546 = vst.msk [vmem:[#allocation3 + $0x50] sm:$0xff] (!%p238_p2), %vm327_vm1, %v4213_v1  ;;  %547 = vst.msk [vmem:[#allocation3 + $0x58] sm:$0xff] (!%p238_p2), %vm327_vm1, %v4213_v1 }
   0xd   : > { %s5034_s25 = smov (!%p4265_p3, %s3452_s25), 1  ;;  %v573_v10 = vld [vmem:[#allocation3 + $0x8] sm:$0xff] }
   0xe   : > { %s3652_s8 = sshll.u32 %s5034_s25, 8  ;;  %3818 = vmatprep.mubr.msk.f32.mxu0 %vm327_vm1, %v573_v10  ;;  %s3653_s10 = sshll.u32 %s5034_s25, 6 }
   0xf   : > { %s4310_s11 = scalar_lea.vmem %s5024_s0, %s3652_s8  ;;  %s5003_s13 = scalar_lea.vmem %s5031_s7, %s3653_s10 }
  0x10   : > { %v279_v3 = vld [vmem:[%s4310_s11] sm:$0xff]  ;;  %v280_v4 = vld [vmem:[%s4310_s11 + $0x8] sm:$0xff]  ;;  %v281_v5 = vld [vmem:[%s4310_s11 + $0x10] sm:$0xff] }
  0x11   : > { %v282_v6 = vld [vmem:[%s4310_s11 + $0x18] sm:$0xff]  ;;  %v311_v7 = vmax.f32 %v279_v3, %v281_v5  ;;  %v283_v8 = vld [vmem:[%s4310_s11 + $0x20] sm:$0xff]  ;;  %v284_v9 = vld [vmem:[%s4310_s11 + $0x28] sm:$0xff]  ;;  %v4362_v5 = vshrl.u32 %v383_v55, 7 }
  0x12   : > { %v312_v11 = vmax.f32 %v280_v4, %v282_v6  ;;  %v285_v12 = vld [vmem:[%s4310_s11 + $0x30] sm:$0xff]  ;;  %v286_v13 = vld [vmem:[%s4310_s11 + $0x38] sm:$0xff]  ;;  %v287_v16 = vld [vmem:[%s4310_s11 + $0x40] sm:$0xff] }
  0x13   : > { %328 = vst.msk [vmem:[#allocation2] sm:$0xff] %vm327_vm1, %v311_v7  ;;  %v313_v14 = vmax.f32 %v283_v8, %v285_v12  ;;  %v314_v15 = vmax.f32 %v284_v9, %v286_v13  ;;  %v288_v17 = vld [vmem:[%s4310_s11 + $0x48] sm:$0xff]  ;;  %v289_v18 = vld [vmem:[%s4310_s11 + $0x50] sm:$0xff]  ;;  %v290_v19 = vld [vmem:[%s4310_s11 + $0x58] sm:$0xff]  ;;  %v4369_v13 = vadd.s32 8, %v4362_v5 }
  0x14   : > { %329 = vst.msk [vmem:[#allocation2 + $0x8] sm:$0xff] %vm327_vm1, %v312_v11  ;;  %v315_v20 = vmax.f32 %v287_v16, %v289_v18  ;;  %v291_v21 = vld [vmem:[%s4310_s11 + $0x60] sm:$0xff]  ;;  %v292_v22 = vld [vmem:[%s4310_s11 + $0x68] sm:$0xff]  ;;  %v316_v23 = vmax.f32 %v288_v17, %v290_v19  ;;  %v293_v24 = vld [vmem:[%s4310_s11 + $0x70] sm:$0xff]  ;;  %v4379_v17 = vadd.s32 16, %v4362_v5 }
  0x15   : > { %330 = vst.msk [vmem:[#allocation2 + $0x10] sm:$0xff] %vm327_vm1, %v313_v14  ;;  %331 = vst.msk [vmem:[#allocation2 + $0x18] sm:$0xff] %vm327_vm1, %v314_v15  ;;  %v294_v25 = vld [vmem:[%s4310_s11 + $0x78] sm:$0xff]  ;;  %v295_v26 = vld [vmem:[%s4310_s11 + $0x80] sm:$0xff]  ;;  %v317_v27 = vmax.f32 %v291_v21, %v293_v24  ;;  %v396_v15 = vand.u32 7, %v4362_v5 }
  0x16   : > { %332 = vst.msk [vmem:[#allocation2 + $0x20] sm:$0xff] %vm327_vm1, %v315_v20  ;;  %v318_v28 = vmax.f32 %v292_v22, %v294_v25  ;;  %v296_v29 = vld [vmem:[%s4310_s11 + $0x88] sm:$0xff]  ;;  %v297_v30 = vld [vmem:[%s4310_s11 + $0x90] sm:$0xff]  ;;  %v298_v31 = vld [vmem:[%s4310_s11 + $0x98] sm:$0xff]  ;;  %v403_v22 = vand.u32 7, %v4369_v13 }
  0x17   : > { %333 = vst.msk [vmem:[#allocation2 + $0x28] sm:$0xff] %vm327_vm1, %v316_v23  ;;  %v319_v32 = vmax.f32 %v295_v26, %v297_v30  ;;  %v320_v33 = vmax.f32 %v296_v29, %v298_v31  ;;  %v299_v34 = vld [vmem:[%s4310_s11 + $0xa0] sm:$0xff]  ;;  %v300_v35 = vld [vmem:[%s4310_s11 + $0xa8] sm:$0xff]  ;;  %v301_v36 = vld [vmem:[%s4310_s11 + $0xb0] sm:$0xff]  ;;  %v4395_v23 = vadd.s32 24, %v4362_v5  ;;  %vm488_vm2 = vcmp.ge.s32.totalorder %v396_v15, 1 }
  0x18   : > { %334 = vst.msk [vmem:[#allocation2 + $0x30] sm:$0xff] %vm327_vm1, %v317_v27  ;;  %335 = vst.msk [vmem:[#allocation2 + $0x38] sm:$0xff] %vm327_vm1, %v318_v28  ;;  %v302_v37 = vld [vmem:[%s4310_s11 + $0xb8] sm:$0xff]  ;;  %v321_v38 = vmax.f32 %v299_v34, %v301_v36  ;;  %v303_v39 = vld [vmem:[%s4310_s11 + $0xc0] sm:$0xff]  ;;  %v4403_v26 = vadd.s32 32, %v4362_v5  ;;  %v4415_v29 = vsel %vm488_vm2, 1.0, %v4213_v1 }
  0x19   : > { %v304_v40 = vld [vmem:[%s4310_s11 + $0xc8] sm:$0xff]  ;;  %336 = vst.msk [vmem:[#allocation2 + $0x40] sm:$0xff] %vm327_vm1, %v319_v32  ;;  %337 = vst.msk [vmem:[#allocation2 + $0x48] sm:$0xff] %vm327_vm1, %v320_v33  ;;  %v322_v41 = vmax.f32 %v300_v35, %v302_v37  ;;  %v305_v42 = vld [vmem:[%s4310_s11 + $0xd0] sm:$0xff]  ;;  %vm489_vm3 = vcmp.ge.s32.totalorder %v403_v22, 1  ;;  %v417_v31 = vand.u32 7, %v4395_v23 }
  0x1a   : > { %v306_v43 = vld [vmem:[%s4310_s11 + $0xd8] sm:$0xff]  ;;  %338 = vst.msk [vmem:[#allocation2 + $0x50] sm:$0xff] %vm327_vm1, %v321_v38  ;;  %v323_v44 = vmax.f32 %v303_v39, %v305_v42  ;;  %v307_v46 = vld [vmem:[%s4310_s11 + $0xe0] sm:$0xff]  ;;  %v309_v47 = vld [vmem:[%s4310_s11 + $0xf0] sm:$0xff]  ;;  %v4421_v32 = vadd.s32 40, %v4362_v5  ;;  %v424_v33 = vand.u32 7, %v4403_v26 }
  0x1b   : > { %v324_v45 = vmax.f32 %v304_v40, %v306_v43  ;;  %v344_v48 = vld [vmem:[#allocation2] ss:$2 sm:$0xff]  ;;  %v360_v49 = vld [vmem:[#allocation2 + $0x1] ss:$2 sm:$0xff]  ;;  %339 = vst.msk [vmem:[#allocation2 + $0x58] sm:$0xff] %vm327_vm1, %v322_v41  ;;  %v325_v51 = vmax.f32 %v307_v46, %v309_v47  ;;  %v310_v57 = vld [vmem:[%s4310_s11 + $0xf8] sm:$0xff] }
  0x1c   : > { %v308_v50 = vld [vmem:[%s4310_s11 + $0xe8] sm:$0xff]  ;;  %v375_v52 = vmax.f32 %v344_v48, %v360_v49  ;;  %v346_v53 = vld [vmem:[#allocation2 + $0x10] ss:$2 sm:$0xff]  ;;  %v362_v54 = vld [vmem:[#allocation2 + $0x11] ss:$2 sm:$0xff]  ;;  %340 = vst.msk [vmem:[#allocation2 + $0x60] sm:$0xff] %vm327_vm1, %v323_v44 }
  0x1d   : > { %341 = vst.msk [vmem:[#allocation2 + $0x68] sm:$0xff] %vm327_vm1, %v324_v45  ;;  %v376_v56 = vmax.f32 %v346_v53, %v362_v54  ;;  %342 = vst.msk [vmem:[#allocation2 + $0x70] sm:$0xff] %vm327_vm1, %v325_v51  ;;  %v326_v60 = vmax.f32 %v308_v50, %v310_v57  ;;  %v3496_v16 = vld [vmem:[%s5025_s1 + $0x8] sm:$0xf]  ;;  %v4425_v34 = vadd.s32 48, %v4362_v5  ;;  %v4435_v37 = vsel %vm489_vm3, 1.0, %v4213_v1 }
  0x1e   : > { %548 = vst.msk [vmem:[#allocation3 + $0x10] sm:$0xff] %vm327_vm1, %v375_v52  ;;  %v348_v58 = vld [vmem:[#allocation2 + $0x20] ss:$2 sm:$0xff]  ;;  %v364_v59 = vld [vmem:[#allocation2 + $0x21] ss:$2 sm:$0xff]  ;;  %vm491_vm5 = vcmp.ge.s32.totalorder %v417_v31, 1 }
  0x1f   : > { %549 = vst.msk [vmem:[#allocation3 + $0x18] sm:$0xff] %vm327_vm1, %v376_v56  ;;  %v377_v61 = vmax.f32 %v348_v58, %v364_v59  ;;  %v350_v62 = vld [vmem:[#allocation2 + $0x30] ss:$2 sm:$0xff]  ;;  %v366_v63 = vld [vmem:[#allocation2 + $0x31] ss:$2 sm:$0xff]  ;;  %343 = vst.msk [vmem:[#allocation2 + $0x78] sm:$0xff] %vm327_vm1, %v326_v60 }
  0x20   : > { %v378_v0 = vmax.f32 %v350_v62, %v366_v63  ;;  %v352_v3 = vld [vmem:[#allocation2 + $0x40] ss:$2 sm:$0xff]  ;;  %v368_v4 = vld [vmem:[#allocation2 + $0x41] ss:$2 sm:$0xff]  ;;  %v431_v41 = vand.u32 7, %v4421_v32  ;;  %v4446_v42 = vadd.s32 56, %v4362_v5 }
  0x21   : > { %550 = vst.msk [vmem:[#allocation3 + $0x20] sm:$0xff] %vm327_vm1, %v377_v61  ;;  %v379_v6 = vmax.f32 %v352_v3, %v368_v4  ;;  %v556_v30 = vld [vmem:[#allocation3 + $0x7] sm:$0xff]  ;;  %vm492_vm6 = vcmp.ge.s32.totalorder %v424_v33, 1  ;;  %v438_v43 = vand.u32 7, %v4425_v34  ;;  %v4457_v46 = vsel %vm491_vm5, 1.0, %v4213_v1 }
  0x22   : > { %551 = vst.msk [vmem:[#allocation3 + $0x28] sm:$0xff] %vm327_vm1, %v378_v0  ;;  %v354_v7 = vld [vmem:[#allocation2 + $0x50] ss:$2 sm:$0xff]  ;;  %v370_v8 = vld [vmem:[#allocation2 + $0x51] ss:$2 sm:$0xff]  ;;  %v564_v36 = vmul.f32 %v4415_v29, %v556_v30  ;;  %v4462_v48 = vsel %vm492_vm6, 1.0, %v4213_v1 }
  0x23   : > { %552 = vst.msk [vmem:[#allocation3 + $0x30] sm:$0xff] %vm327_vm1, %v379_v6  ;;  %v380_v9 = vmax.f32 %v354_v7, %v370_v8  ;;  %vm493_vm7 = vcmp.ge.s32.totalorder %v431_v41, 1  ;;  %v445_v50 = vand.u32 7, %v4446_v42  ;;  %vm494_vm8 = vcmp.ge.s32.totalorder %v438_v43, 1  ;;  %v3506_v51 = vld [vmem:[%s5025_s1 + $0xc] sm:$0xf] }
  0x24   : > { %v356_v10 = vld [vmem:[#allocation2 + $0x60] ss:$2 sm:$0xff]  ;;  %v372_v11 = vld [vmem:[#allocation2 + $0x61] ss:$2 sm:$0xff]  ;;  %v4478_v54 = vsel %vm493_vm7, 1.0, %v4213_v1  ;;  %v4483_v56 = vsel %vm494_vm8, 1.0, %v4213_v1 }
  0x25   : > { %v381_v12 = vmax.f32 %v356_v10, %v372_v11  ;;  %v4371_v14 = vld [vmem:[#allocation3 + $0x10] sm:$0xff]  ;;  %553 = vst.msk [vmem:[#allocation3 + $0x38] sm:$0xff] %vm327_vm1, %v380_v9  ;;  %vm495_vm9 = vcmp.ge.s32.totalorder %v445_v50, 1  ;;  %vm512_vm10 = vcmp.le.s32.totalorder %v396_v15, 6  ;;  %vm513_vm11 = vcmp.le.s32.totalorder %v403_v22, 6 }
  0x26   : > { %3819 = vmatmul.mubr.msk.f32.vlgmr.msra.gmra.mrb[0].mxu0 %vm327_vm1, %v4371_v14  ;;  %v4383_v18 = vld [vmem:[#allocation3 + $0x18] sm:$0xff]  ;;  %v4437_v38 = vld [vmem:[#allocation3 + $0xf] sm:$0xff]  ;;  %v4497_v60 = vsel %vm495_vm9, 1.0, %v4213_v1  ;;  %v4502_v62 = vsel %vm512_vm10, 1.0, %v4213_v1  ;;  %v4512_v4 = vsel %vm513_vm11, 1.0, %v4213_v1  ;;  %vm515_vm13 = vcmp.le.s32.totalorder %v417_v31, 6 }
  0x27   : > { %554 = vst.msk [vmem:[#allocation3 + $0x40] sm:$0xff] %vm327_vm1, %v381_v12  ;;  %3831 = vmatpush3.msk.msra.mxu0 %vm607_vm0, %v4297_v2  ;;  %3821 = vmatprep.mubr.msk.f32.mxu0 %vm327_vm1, %v4383_v18  ;;  %v358_v19 = vld [vmem:[#allocation2 + $0x70] ss:$2 sm:$0xff]  ;;  %v374_v20 = vld [vmem:[#allocation2 + $0x71] ss:$2 sm:$0xff]  ;;  %v410_v2 = vand.u32 7, %v4379_v17  ;;  %v565_v44 = vmul.f32 %v4435_v37, %v4437_v38  ;;  %v1014_v32 = vmul.f32 %v4415_v29, %v4437_v38 }
  0x28   : > { %v4390_v21 = vld [vmem:[#allocation3 + $0x20] sm:$0xff]  ;;  %3844 = vmatprep.subr.msk.mxu0 %vm607_vm0, %v3496_v16  ;;  %v382_v24 = vmax.f32 %v358_v19, %v374_v20  ;;  %v4442_v40 = vld [vmem:[#allocation3 + $0x17] sm:$0xff]  ;;  %v848_v63 = vld [vmem:[#allocation3 + $0x9] sm:$0xff]  ;;  %vm516_vm14 = vcmp.le.s32.totalorder %v424_v33, 6  ;;  %v4528_v10 = vsel %vm515_vm13, 1.0, %v4213_v1  ;;  %vm517_vm15 = vcmp.le.s32.totalorder %v431_v41, 6 }
  0x29   : > { %v4397_v25 = vld [vmem:[#allocation3 + $0x28] sm:$0xff]  ;;  %vm490_vm4 = vcmp.ge.s32.totalorder %v410_v2, 1  ;;  %v4459_v47 = vld [vmem:[#allocation3 + $0x1f] sm:$0xff]  ;;  %vm514_vm12 = vcmp.le.s32.totalorder %v410_v2, 6  ;;  %v856_v3 = vmul.f32 %v4502_v62, %v848_v63  ;;  %v4514_v5 = vld [vmem:[#allocation3 + $0x11] sm:$0xff]  ;;  %v4533_v12 = vsel %vm516_vm14, 1.0, %v4213_v1 }
  0x2a   : > { %3822 = vmatmul.mubr.msk.f32.gmra.mrb[2].mxu0 %vm327_vm1, %v4390_v21  ;;  %555 = vst.msk [vmem:[#allocation3 + $0x48] sm:$0xff] %vm327_vm1, %v382_v24  ;;  %v4410_v27 = vld [vmem:[#allocation3 + $0x30] sm:$0xff]  ;;  %v4440_v39 = vsel %vm490_vm4, 1.0, %v4213_v1  ;;  %v4464_v49 = vld [vmem:[#allocation3 + $0x27] sm:$0xff]  ;;  %v567_v52 = vmul.f32 %v4457_v46, %v4459_v47  ;;  %v4517_v6 = vsel %vm514_vm12, 1.0, %v4213_v1  ;;  %v4519_v7 = vld [vmem:[#allocation3 + $0x19] sm:$0xff]  ;;  %v857_v8 = vmul.f32 %v4512_v4, %v4514_v5 }
  0x2b   : > { %3824 = vmatprep.mubr.msk.f32.mxu0 %vm327_vm1, %v4397_v25  ;;  %v566_v45 = vmul.f32 %v4440_v39, %v4442_v40  ;;  %v568_v53 = vmul.f32 %v4462_v48, %v4464_v49  ;;  %v4480_v55 = vld [vmem:[#allocation3 + $0x2f] sm:$0xff]  ;;  %v858_v9 = vmul.f32 %v4517_v6, %v4519_v7  ;;  %v4530_v11 = vld [vmem:[#allocation3 + $0x21] sm:$0xff]  ;;  %vm518_vm2 = vcmp.le.s32.totalorder %v438_v43, 6 }
  0x2c   : > { %v4412_v28 = vld [vmem:[#allocation3 + $0x38] sm:$0xff]  ;;  %v569_v58 = vmul.f32 %v4478_v54, %v4480_v55  ;;  %v4535_v13 = vld [vmem:[#allocation3 + $0x29] sm:$0xff]  ;;  %v4548_v19 = vsel %vm517_vm15, 1.0, %v4213_v1  ;;  %v4553_v22 = vsel %vm518_vm2, 1.0, %v4213_v1  ;;  %vm519_vm3 = vcmp.le.s32.totalorder %v445_v50, 6 }
  0x2d   : > { %v4485_v57 = vld [vmem:[#allocation3 + $0x37] sm:$0xff]  ;;  %v3516_v15 = vld [vmem:[%s5025_s1 + $0x10] sm:$0xf]  ;;  %v860_v17 = vmul.f32 %v4533_v12, %v4535_v13  ;;  %v4565_v26 = vsel %vm519_vm3, 1.0, %v4213_v1  ;;  %v1015_v33 = vmul.f32 %v4435_v37, %v4442_v40  ;;  %v1016_v34 = vmul.f32 %v4440_v39, %v4459_v47 }
  0x2e   : > { %3825 = vmatmul.mubr.msk.f32.gmra.mrb[4].mxu0 %vm327_vm1, %v4410_v27  ;;  %v4431_v35 = vld [vmem:[#allocation3 + $0x40] sm:$0xff]  ;;  %v570_v59 = vmul.f32 %v4483_v56, %v4485_v57  ;;  %v4550_v20 = vld [vmem:[#allocation3 + $0x31] sm:$0xff]  ;;  %v1017_v41 = vmul.f32 %v4457_v46, %v4464_v49  ;;  %v1018_v38 = vmul.f32 %v4462_v48, %v4480_v55  ;;  %v1019_v42 = vmul.f32 %v4478_v54, %v4485_v57 }
  0x2f   : > { %3827 = vmatprep.mubr.msk.f32.mxu0 %vm327_vm1, %v4412_v28  ;;  %v4499_v61 = vld [vmem:[#allocation3 + $0x3f] sm:$0xff]  ;;  %v861_v24 = vmul.f32 %v4548_v19, %v4550_v20  ;;  %v3536_v50 = vld [vmem:[%s5025_s1 + $0x18] sm:$0xf]  ;;  %v1326_v63 = vmul.f32 %v4533_v12, %v4550_v20 }
  0x30   : > { %v571_v0 = vmul.f32 %v4497_v60, %v4499_v61  ;;  %v4555_v23 = vld [vmem:[#allocation3 + $0x39] sm:$0xff]  ;;  %v1020_v43 = vmul.f32 %v4483_v56, %v4499_v61 }
  0x31   : > { %v862_v2 = vmul.f32 %v4553_v22, %v4555_v23  ;;  %v4567_v30 = vld [vmem:[#allocation3 + $0x41] sm:$0xff] }
  0x32   : > { %3828 = vmatmul.mubr.msk.f32.gmra.mrb[6].mxu0 %vm327_vm1, %v4431_v35  ;;  %v863_v31 = vmul.f32 %v4565_v26, %v4567_v30 }
  0x33   : > { %3832 = vmatprep.mubr.msk.f32.mxu0 %vm327_vm1, %v564_v36  ;;  %v3526_v36 = vld [vmem:[%s5025_s1 + $0x14] sm:$0xf] }
  0x36   : > { %3833 = vmatmul.mubr.msk.f32.vlgmr.msra.gmra.mrb[0].mxu0 %vm327_vm1, %v565_v44  ;;  %v1013_v44 = vld [vmem:[#allocation3 + $0x47] sm:$0xff] }
  0x37   : > { %3845 = vmatpush3.msk.msra.mxu0 %vm607_vm0, %v3496_v16  ;;  %3835 = vmatprep.mubr.msk.f32.mxu0 %vm327_vm1, %v566_v45  ;;  %v859_v16 = vmul.f32 %v4528_v10, %v4530_v11  ;;  %v1021_v45 = vmul.f32 %v4497_v60, %v1013_v44 }
  0x38   : > { %3858 = vmatprep.subr.msk.mxu0 %vm607_vm0, %v3506_v51 }
  0x3a   : > { %3836 = vmatmul.mubr.msk.f32.gmra.mrb[2].mxu0 %vm327_vm1, %v567_v52  ;;  %v1323_v52 = vmul.f32 %v4512_v4, %v4519_v7 }
  0x3b   : > { %3838 = vmatprep.mubr.msk.f32.mxu0 %vm327_vm1, %v568_v53  ;;  %v1324_v53 = vmul.f32 %v4517_v6, %v4530_v11 }
  0x3e   : > { %3839 = vmatmul.mubr.msk.f32.gmra.mrb[4].mxu0 %vm327_vm1, %v569_v58  ;;  %v3546_v58 = vld [vmem:[%s5025_s1 + $0x1c] sm:$0xf] }
  0x3f   : > { %3841 = vmatprep.mubr.msk.f32.mxu0 %vm327_vm1, %v570_v59  ;;  %v1325_v59 = vmul.f32 %v4528_v10, %v4535_v13 }
  0x42   : > { %3842 = vmatmul.mubr.msk.f32.gmra.mrb[6].mxu0 %vm327_vm1, %v571_v0  ;;  %v1327_v0 = vmul.f32 %v4548_v19, %v4555_v23 }
  0x43   : > { %3846 = vmatprep.mubr.msk.f32.mxu0 %vm327_vm1, %v856_v3  ;;  %v1328_v3 = vmul.f32 %v4553_v22, %v4567_v30 }
  0x46   : > { %3847 = vmatmul.mubr.msk.f32.vlgmr.msra.gmra.mrb[0].mxu0 %vm327_vm1, %v857_v8 }
  0x47   : > { %3859 = vmatpush3.msk.msra.mxu0 %vm607_vm0, %v3506_v51  ;;  %3849 = vmatprep.mubr.msk.f32.mxu0 %vm327_vm1, %v858_v9  ;;  %v1322_v51 = vmul.f32 %v4502_v62, %v4514_v5  ;;  %v1321_v5 = vld [vmem:[#allocation3 + $0x49] sm:$0xff]  ;;  %v1480_v9 = vmul.f32 %v4415_v29, %v4442_v40  ;;  %v1484_v40 = vmul.f32 %v4462_v48, %v4485_v57 }
  0x48   : > { %3872 = vmatprep.subr.msk.mxu0 %vm607_vm0, %v3516_v15  ;;  %v1329_v8 = vmul.f32 %v4565_v26, %v1321_v5  ;;  %v1793_v57 = vmul.f32 %v4548_v19, %v4567_v30  ;;  %v3566_v30 = vld [vmem:[%s5026_s2] ss:$0 sm:$0xff] }
  0x4a   : > { %3850 = vmatmul.mubr.msk.f32.gmra.mrb[2].mxu0 %vm327_vm1, %v859_v16  ;;  %v1482_v16 = vmul.f32 %v4440_v39, %v4464_v49  ;;  %v1486_v49 = vmul.f32 %v4483_v56, %v1013_v44 }
  0x4b   : > { %3852 = vmatprep.mubr.msk.f32.mxu0 %vm327_vm1, %v860_v17  ;;  %v3556_v17 = vld [vmem:[%s5025_s1 + $0x20] sm:$0xf] }
  0x4e   : > { %3853 = vmatmul.mubr.msk.f32.gmra.mrb[4].mxu0 %vm327_vm1, %v861_v24  ;;  %v1483_v24 = vmul.f32 %v4457_v46, %v4480_v55 }
  0x4f   : > { %3855 = vmatprep.mubr.msk.f32.mxu0 %vm327_vm1, %v862_v2  ;;  %v1479_v2 = vld [vmem:[#allocation3 + $0x4f] sm:$0xff] }
  0x50   : > { %v1487_v55 = vmul.f32 %v4497_v60, %v1479_v2 }
  0x52   : > { %3856 = vmatmul.mubr.msk.f32.gmra.mrb[6].mxu0 %vm327_vm1, %v863_v31 }
  0x53   : > { %3860 = vmatprep.mubr.msk.f32.mxu0 %vm327_vm1, %v1014_v32 }
  0x56   : > { %3861 = vmatmul.mubr.msk.f32.vlgmr.msra.gmra.mrb[0].mxu0 %vm327_vm1, %v1015_v33 }
  0x57   : > { %3873 = vmatpush3.msk.msra.mxu0 %vm607_vm0, %v3516_v15  ;;  %3863 = vmatprep.mubr.msk.f32.mxu0 %vm327_vm1, %v1016_v34  ;;  %v1481_v15 = vmul.f32 %v4435_v37, %v4459_v47  ;;  %v1485_v47 = vmul.f32 %v4478_v54, %v4499_v61  ;;  %v1794_v61 = vmul.f32 %v4553_v22, %v1321_v5 }
  0x58   : > { %3886 = vmatprep.subr.msk.mxu0 %vm607_vm0, %v3526_v36 }
  0x5a   : > { %3864 = vmatmul.mubr.msk.f32.gmra.mrb[2].mxu0 %vm327_vm1, %v1017_v41 }
  0x5b   : > { %3866 = vmatprep.mubr.msk.f32.mxu0 %vm327_vm1, %v1018_v38 }
  0x5e   : > { %3867 = vmatmul.mubr.msk.f32.gmra.mrb[4].mxu0 %vm327_vm1, %v1019_v42 }
  0x5f   : > { %3869 = vmatprep.mubr.msk.f32.mxu0 %vm327_vm1, %v1020_v43 }
  0x62   : > { %3870 = vmatmul.mubr.msk.f32.gmra.mrb[6].mxu0 %vm327_vm1, %v1021_v45 }
  0x63   : > { %3874 = vmatprep.mubr.msk.f32.mxu0 %vm327_vm1, %v4371_v14  ;;  %v1171_v14 = vld [vmem:[#allocation3 + $0x48] sm:$0xff] }
  0x66   : > { %3875 = vmatmul.mubr.msk.f32.vlgmr.msra.gmra.mrb[0].mxu0 %vm327_vm1, %v4383_v18 }
  0x67   : > { %3887 = vmatpush3.msk.msra.mxu0 %vm607_vm0, %v3526_v36  ;;  %3877 = vmatprep.mubr.msk.f32.mxu0 %vm327_vm1, %v4390_v21 }
  0x68   : > { %3900 = vmatprep.subr.msk.mxu0 %vm607_vm0, %v3536_v50 }
  0x6a   : > { %3878 = vmatmul.mubr.msk.f32.gmra.mrb[2].mxu0 %vm327_vm1, %v4397_v25 }
  0x6b   : > { %3880 = vmatprep.mubr.msk.f32.mxu0 %vm327_vm1, %v4410_v27 }
  0x6e   : > { %3881 = vmatmul.mubr.msk.f32.gmra.mrb[4].mxu0 %vm327_vm1, %v4412_v28 }
  0x6f   : > { %3883 = vmatprep.mubr.msk.f32.mxu0 %vm327_vm1, %v4431_v35 }
  0x72   : > { %3884 = vmatmul.mubr.msk.f32.gmra.mrb[6].mxu0 %vm327_vm1, %v1171_v14 }
  0x73   : > { %3888 = vmatprep.mubr.msk.f32.mxu0 %vm327_vm1, %v1322_v51 }
  0x76   : > { %3889 = vmatmul.mubr.msk.f32.vlgmr.msra.gmra.mrb[0].mxu0 %vm327_vm1, %v1323_v52 }
  0x77   : > { %3901 = vmatpush3.msk.msra.mxu0 %vm607_vm0, %v3536_v50  ;;  %3891 = vmatprep.mubr.msk.f32.mxu0 %vm327_vm1, %v1324_v53 }
  0x78   : > { %3914 = vmatprep.subr.msk.mxu0 %vm607_vm0, %v3546_v58 }
  0x7a   : > { %3892 = vmatmul.mubr.msk.f32.gmra.mrb[2].mxu0 %vm327_vm1, %v1325_v59 }
  0x7b   : > { %3894 = vmatprep.mubr.msk.f32.mxu0 %vm327_vm1, %v1326_v63 }
  0x7e   : > { %3895 = vmatmul.mubr.msk.f32.gmra.mrb[4].mxu0 %vm327_vm1, %v1327_v0 }
  0x7f   : > { %3897 = vmatprep.mubr.msk.f32.mxu0 %vm327_vm1, %v1328_v3 }
  0x82   : > { %3898 = vmatmul.mubr.msk.f32.gmra.mrb[6].mxu0 %vm327_vm1, %v1329_v8 }
  0x83   : > { %3902 = vmatprep.mubr.msk.f32.mxu0 %vm327_vm1, %v1480_v9 }
  0x86   : > { %3903 = vmatmul.mubr.msk.f32.vlgmr.msra.gmra.mrb[0].mxu0 %vm327_vm1, %v1481_v15 }
  0x87   : > { %3915 = vmatpush3.msk.msra.mxu0 %vm607_vm0, %v3546_v58  ;;  %3905 = vmatprep.mubr.msk.f32.mxu0 %vm327_vm1, %v1482_v16 }
  0x88   : > { %3928 = vmatprep.subr.msk.mxu0 %vm607_vm0, %v3556_v17 }
  0x8a   : > { %3906 = vmatmul.mubr.msk.f32.gmra.mrb[2].mxu0 %vm327_vm1, %v1483_v24 }
  0x8b   : > { %3908 = vmatprep.mubr.msk.f32.mxu0 %vm327_vm1, %v1484_v40 }
  0x8e   : > { %3909 = vmatmul.mubr.msk.f32.gmra.mrb[4].mxu0 %vm327_vm1, %v1485_v47 }
  0x8f   : > { %3911 = vmatprep.mubr.msk.f32.mxu0 %vm327_vm1, %v1486_v49  ;;  %v3585_v49 = vld [vmem:[%s5028_s4 + $0x10] sm:$0xff] }
  0x92   : > { %3912 = vmatmul.mubr.msk.f32.gmra.mrb[6].mxu0 %vm327_vm1, %v1487_v55 }
  0x93   : > { %3916 = vmatprep.mubr.msk.f32.mxu0 %vm327_vm1, %v4383_v18  ;;  %v1637_v18 = vld [vmem:[#allocation3 + $0x50] sm:$0xff] }
  0x96   : > { %3917 = vmatmul.mubr.msk.f32.vlgmr.msra.gmra.mrb[0].mxu0 %vm327_vm1, %v4390_v21  ;;  %v1788_v21 = vmul.f32 %v4502_v62, %v4519_v7  ;;  %v1787_v7 = vld [vmem:[#allocation3 + $0x51] sm:$0xff] }
  0x97   : > { %3929 = vmatpush3.msk.msra.mxu0 %vm607_vm0, %v3556_v17  ;;  %3919 = vmatprep.mubr.msk.f32.mxu0 %vm327_vm1, %v4397_v25  ;;  %v1789_v25 = vmul.f32 %v4512_v4, %v4530_v11  ;;  %v1795_v11 = vmul.f32 %v4565_v26, %v1787_v7  ;;  %vm1976_vm0 = vcmask 64512  }
  0x98   : > { %1980 = vst.msk [vmem:[#allocation4 + $0x18] sm:$0xff] %vm1976_vm0, %v4213_v1  ;;  %1977 = vst.msk [vmem:[#allocation4] sm:$0xff] %vm1976_vm0, %v4213_v1 }
  0x99   : > { %1978 = vst.msk [vmem:[#allocation4 + $0x8] sm:$0xff] %vm1976_vm0, %v4213_v1  ;;  %1979 = vst.msk [vmem:[#allocation4 + $0x10] sm:$0xff] %vm1976_vm0, %v4213_v1 }
  0x9a   : > { %3920 = vmatmul.mubr.msk.f32.gmra.mrb[2].mxu0 %vm327_vm1, %v4410_v27  ;;  %v1790_v27 = vmul.f32 %v4517_v6, %v4535_v13  ;;  %1981 = vst.msk [vmem:[#allocation4 + $0x20] sm:$0xff] %vm1976_vm0, %v4213_v1  ;;  %1982 = vst.msk [vmem:[#allocation4 + $0x28] sm:$0xff] %vm1976_vm0, %v4213_v1  ;;  %v3568_v13 = vld [vmem:[%s5028_s4 + $0x8] sm:$0xff] }
  0x9b   : > { %3922 = vmatprep.mubr.msk.f32.mxu0 %vm327_vm1, %v4412_v28  ;;  %v1791_v28 = vmul.f32 %v4528_v10, %v4550_v20  ;;  %1983 = vst.msk [vmem:[#allocation4 + $0x30] sm:$0xff] %vm1976_vm0, %v4213_v1  ;;  %1984 = vst.msk [vmem:[#allocation4 + $0x38] sm:$0xff] %vm1976_vm0, %v4213_v1  ;;  %3942 = vmatprep.subr.mxu1 %v3568_v13 }
  0x9c   : > { %1985 = vst.msk [vmem:[#allocation4 + $0x40] sm:$0xff] %vm1976_vm0, %v4213_v1  ;;  %1986 = vst.msk [vmem:[#allocation4 + $0x48] sm:$0xff] %vm1976_vm0, %v4213_v1  ;;  %3943 = vmatpush3.msra.mxu1 %v3568_v13 }
  0x9d   : > { %1987 = vst.msk [vmem:[#allocation4 + $0x50] sm:$0xff] %vm1976_vm0, %v4213_v1  ;;  %1988 = vst.msk [vmem:[#allocation4 + $0x58] sm:$0xff] %vm1976_vm0, %v4213_v1  ;;  %v3567_v1 = vld [vmem:[%s5027_s3] ss:$0 sm:$0xff] }
  0x9e   : > { %3923 = vmatmul.mubr.msk.f32.gmra.mrb[4].mxu0 %vm327_vm1, %v4431_v35  ;;  %v1792_v35 = vmul.f32 %v4533_v12, %v4555_v23  ;;  %v2013_v23 = vld [vmem:[%s5028_s4] sm:$0xff] }
  0x9f   : > { %3925 = vmatprep.mubr.msk.f32.mxu0 %vm327_vm1, %v1171_v14  ;;  %3956 = vmatprep.subr.mxu1 %v2013_v23 }
  0xa0   : > { %v2014_v20 = vld [vmem:[#allocation4 + $0x8] sm:$0xff] }
  0xa1   : > { %3944 = vmatprep.mubr.msk.f32.mxu1 %vm1976_vm0, %v2014_v20 }
  0xa2   : > { %3926 = vmatmul.mubr.msk.f32.gmra.mrb[6].mxu0 %vm327_vm1, %v1637_v18 }
  0xa3   : > { %3930 = vmatprep.mubr.msk.f32.mxu0 %vm327_vm1, %v1788_v21 }
  0xa6   : > { %3931 = vmatmul.mubr.msk.f32.vlgmr.msra.gmra.mrb[0].mxu0 %vm327_vm1, %v1789_v25 }
  0xa7   : > { %3933 = vmatprep.mubr.msk.f32.mxu0 %vm327_vm1, %v1790_v27 }
  0xaa   : > { %3934 = vmatmul.mubr.msk.f32.gmra.mrb[2].mxu0 %vm327_vm1, %v1791_v28  ;;  %v1997_v28 = vld [vmem:[#allocation4 + $0x7] sm:$0xff] }
  0xab   : > { %3936 = vmatprep.mubr.msk.f32.mxu0 %vm327_vm1, %v1792_v35 }
  0xae   : > { %3937 = vmatmul.mubr.msk.f32.gmra.mrb[4].mxu0 %vm327_vm1, %v1793_v57 }
  0xaf   : > { %3939 = vmatprep.mubr.msk.f32.mxu0 %vm327_vm1, %v1794_v61  ;;  %v2005_v61 = vmul.f32 %v4415_v29, %v1997_v28 }
  0xb2   : > { %3940 = vmatmul.mubr.msk.f32.gmra.mrb[6].mxu0 %vm327_vm1, %v1795_v11 }
 0x179   : > { %v3932_v31 = vpop.f32.mrb[0].mxu0 }
 0x17a   : > { %v1946_v32 = vmul.f32 %v3932_v31, %v3566_v30  ;;  %v1891_v33 = vpop.f32.mrb[1].mxu0  ;;  %v3594_v31 = vld [vmem:[%s5028_s4 + $0x18] sm:$0xff] }
 0x17b   : > { %v1945_v34 = vmul.f32 %v3566_v30, %v1891_v33 }
 0x17c   : > { %v1961_v36 = vadd.f32 %v3567_v1, %v1946_v32 }
 0x17d   : > { %v1960_v41 = vadd.f32 %v3567_v1, %v1945_v34  ;;  %v3935_v38 = vpop.f32.mrb[2].mxu0 }
 0x17e   : > { %v1969_v42 = vmax.f32 %v1961_v36, 0.0  ;;  %v1948_v43 = vmul.f32 %v3935_v38, %v3566_v30  ;;  %v1901_v44 = vpop.f32.mrb[3].mxu0 }
 0x17f   : > { %v1968_v45 = vmax.f32 %v1960_v41, 0.0  ;;  %v1947_v50 = vmul.f32 %v3566_v30, %v1901_v44 }
 0x180   : > { %1990 = vst.msk [vmem:[#allocation4 + $0x18] sm:$0xff] %vm1976_vm0, %v1969_v42  ;;  %v1963_v14 = vadd.f32 %v3567_v1, %v1948_v43 }
 0x181   : > { %1989 = vst.msk [vmem:[#allocation4 + $0x10] sm:$0xff] %vm1976_vm0, %v1968_v45  ;;  %v1962_v51 = vadd.f32 %v3567_v1, %v1947_v50  ;;  %v3938_v52 = vpop.f32.mrb[4].mxu0 }
 0x182   : > { %v1971_v53 = vmax.f32 %v1963_v14, 0.0  ;;  %v1950_v58 = vmul.f32 %v3938_v52, %v3566_v30  ;;  %v1911_v59 = vpop.f32.mrb[5].mxu0 }
 0x183   : > { %v1970_v63 = vmax.f32 %v1962_v51, 0.0  ;;  %v1949_v0 = vmul.f32 %v3566_v30, %v1911_v59 }
 0x184   : > { %1992 = vst.msk [vmem:[#allocation4 + $0x28] sm:$0xff] %vm1976_vm0, %v1971_v53  ;;  %v1965_v3 = vadd.f32 %v3567_v1, %v1950_v58  ;;  %v3603_v58 = vld [vmem:[%s5028_s4 + $0x20] sm:$0xff] }
 0x185   : > { %1991 = vst.msk [vmem:[#allocation4 + $0x20] sm:$0xff] %vm1976_vm0, %v1970_v63  ;;  %v1964_v5 = vadd.f32 %v3567_v1, %v1949_v0  ;;  %v3941_v8 = vpop.f32.mrb[6].mxu0 }
 0x186   : > { %v1973_v9 = vmax.f32 %v1965_v3, 0.0  ;;  %v1952_v15 = vmul.f32 %v3941_v8, %v3566_v30  ;;  %v1921_v16 = vpop.f32.mrb[7].mxu0 }
 0x187   : > { %v1972_v17 = vmax.f32 %v1964_v5, 0.0  ;;  %v1951_v24 = vmul.f32 %v3566_v30, %v1921_v16  ;;  %v4764_v55 = vld [vmem:[#allocation4 + $0x18] sm:$0xff] }
 0x188   : > { %1994 = vst.msk [vmem:[#allocation4 + $0x38] sm:$0xff] %vm1976_vm0, %v1973_v9  ;;  %v1967_v40 = vadd.f32 %v3567_v1, %v1952_v15  ;;  %v4756_v47 = vld [vmem:[#allocation4 + $0x10] sm:$0xff] }
 0x189   : > { %1993 = vst.msk [vmem:[#allocation4 + $0x30] sm:$0xff] %vm1976_vm0, %v1972_v17  ;;  %v1966_v2 = vadd.f32 %v3567_v1, %v1951_v24  ;;  %3945 = vmatmul.mubr.msk.f32.vlgmr.msra.gmra.mrb[0].mxu1 %vm1976_vm0, %v4756_v47  ;;  %v1998_v11 = vld [vmem:[#allocation4 + $0xf] sm:$0xff]  ;;  %v4791_v13 = vld [vmem:[#allocation4 + $0x17] sm:$0xff] }
 0x18a   : > { %v1975_v18 = vmax.f32 %v1967_v40, 0.0  ;;  %3957 = vmatpush3.msra.mxu1 %v2013_v23  ;;  %3947 = vmatprep.mubr.msk.f32.mxu1 %vm1976_vm0, %v4764_v55  ;;  %v2006_v20 = vmul.f32 %v4435_v37, %v1998_v11  ;;  %v2007_v23 = vmul.f32 %v4440_v39, %v4791_v13  ;;  %v2282_v43 = vld [vmem:[#allocation4 + $0x9] sm:$0xff]  ;;  %v2283_v50 = vld [vmem:[#allocation4 + $0x11] sm:$0xff]  ;;  %v2445_v17 = vmul.f32 %v4415_v29, %v1998_v11 }
 0x18b   : > { %v1974_v21 = vmax.f32 %v1966_v2, 0.0  ;;  %3970 = vmatprep.subr.mxu1 %v3585_v49  ;;  %v4774_v27 = vld [vmem:[#allocation4 + $0x28] sm:$0xff]  ;;  %v2290_v45 = vmul.f32 %v4502_v62, %v2282_v43  ;;  %v2291_v51 = vmul.f32 %v4512_v4, %v2283_v50  ;;  %v2446_v24 = vmul.f32 %v4435_v37, %v4791_v13 }
 0x18c   : > { %1996 = vst.msk [vmem:[#allocation4 + $0x48] sm:$0xff] %vm1976_vm0, %v1975_v18  ;;  %v4769_v25 = vld [vmem:[#allocation4 + $0x20] sm:$0xff] }
 0x18d   : > { %1995 = vst.msk [vmem:[#allocation4 + $0x40] sm:$0xff] %vm1976_vm0, %v1974_v21  ;;  %3948 = vmatmul.mubr.msk.f32.gmra.mrb[2].mxu1 %vm1976_vm0, %v4769_v25  ;;  %v4797_v30 = vld [vmem:[#allocation4 + $0x1f] sm:$0xff]  ;;  %v4803_v1 = vld [vmem:[#allocation4 + $0x27] sm:$0xff] }
 0x18e   : > { %3950 = vmatprep.mubr.msk.f32.mxu1 %vm1976_vm0, %v4774_v27  ;;  %v2008_v32 = vmul.f32 %v4457_v46, %v4797_v30  ;;  %v2009_v33 = vmul.f32 %v4462_v48, %v4803_v1  ;;  %v4828_v14 = vld [vmem:[#allocation4 + $0x19] sm:$0xff]  ;;  %v4834_v53 = vld [vmem:[#allocation4 + $0x21] sm:$0xff]  ;;  %v2447_v40 = vmul.f32 %v4440_v39, %v4797_v30  ;;  %v2448_v2 = vmul.f32 %v4457_v46, %v4803_v1 }
 0x18f   : > { %v4782_v57 = vld [vmem:[#allocation4 + $0x38] sm:$0xff]  ;;  %v2292_v52 = vmul.f32 %v4517_v6, %v4828_v14  ;;  %v2293_v63 = vmul.f32 %v4528_v10, %v4834_v53 }
 0x190   : > { %v4778_v35 = vld [vmem:[#allocation4 + $0x30] sm:$0xff] }
 0x191   : > { %3951 = vmatmul.mubr.msk.f32.gmra.mrb[4].mxu1 %vm1976_vm0, %v4778_v35  ;;  %v4810_v34 = vld [vmem:[#allocation4 + $0x2f] sm:$0xff]  ;;  %v4813_v36 = vld [vmem:[#allocation4 + $0x37] sm:$0xff] }
 0x192   : > { %3953 = vmatprep.mubr.msk.f32.mxu1 %vm1976_vm0, %v4782_v57  ;;  %v2010_v41 = vmul.f32 %v4478_v54, %v4810_v34  ;;  %v2011_v38 = vmul.f32 %v4483_v56, %v4813_v36  ;;  %v4840_v59 = vld [vmem:[#allocation4 + $0x29] sm:$0xff]  ;;  %v4847_v3 = vld [vmem:[#allocation4 + $0x31] sm:$0xff]  ;;  %v2449_v18 = vmul.f32 %v4462_v48, %v4810_v34  ;;  %v2450_v21 = vmul.f32 %v4478_v54, %v4813_v36 }
 0x193   : > { %v2294_v0 = vmul.f32 %v4533_v12, %v4840_v59  ;;  %v2295_v8 = vmul.f32 %v4548_v19, %v4847_v3 }
 0x194   : > { %v4787_v7 = vld [vmem:[#allocation4 + $0x40] sm:$0xff] }
 0x195   : > { %3954 = vmatmul.mubr.msk.f32.gmra.mrb[6].mxu1 %vm1976_vm0, %v4787_v7  ;;  %v4820_v42 = vld [vmem:[#allocation4 + $0x3f] sm:$0xff] }
 0x196   : > { %3958 = vmatprep.mubr.msk.f32.mxu1 %vm1976_vm0, %v2005_v61  ;;  %v2012_v44 = vmul.f32 %v4497_v60, %v4820_v42  ;;  %v4850_v5 = vld [vmem:[#allocation4 + $0x39] sm:$0xff]  ;;  %v4857_v15 = vld [vmem:[#allocation4 + $0x41] sm:$0xff]  ;;  %v2451_v28 = vmul.f32 %v4483_v56, %v4820_v42 }
 0x197   : > { %v2296_v9 = vmul.f32 %v4553_v22, %v4850_v5  ;;  %v2297_v16 = vmul.f32 %v4565_v26, %v4857_v15  ;;  %v2444_v61 = vld [vmem:[#allocation4 + $0x47] sm:$0xff]  ;;  %v2752_v43 = vmul.f32 %v4548_v19, %v4850_v5 }
 0x198   : > { %v2452_v11 = vmul.f32 %v4497_v60, %v2444_v61 }
 0x199   : > { %3959 = vmatmul.mubr.msk.f32.vlgmr.msra.gmra.mrb[0].mxu1 %vm1976_vm0, %v2006_v20  ;;  %v3621_v20 = vld [vmem:[%s5028_s4 + $0x30] sm:$0xff] }
 0x19a   : > { %3971 = vmatpush3.msra.mxu1 %v3585_v49  ;;  %3961 = vmatprep.mubr.msk.f32.mxu1 %vm1976_vm0, %v2007_v23  ;;  %v3612_v49 = vld [vmem:[%s5028_s4 + $0x28] sm:$0xff]  ;;  %v2747_v23 = vmul.f32 %v4502_v62, %v2283_v50 }
 0x19b   : > { %3984 = vmatprep.subr.mxu1 %v3594_v31 }
 0x19d   : > { %3962 = vmatmul.mubr.msk.f32.gmra.mrb[2].mxu1 %vm1976_vm0, %v2008_v32  ;;  %v2749_v32 = vmul.f32 %v4517_v6, %v4834_v53 }
 0x19e   : > { %3964 = vmatprep.mubr.msk.f32.mxu1 %vm1976_vm0, %v2009_v33  ;;  %v3630_v33 = vld [vmem:[%s5028_s4 + $0x38] sm:$0xff] }
 0x1a1   : > { %3965 = vmatmul.mubr.msk.f32.gmra.mrb[4].mxu1 %vm1976_vm0, %v2010_v41  ;;  %v2750_v41 = vmul.f32 %v4528_v10, %v4840_v59 }
 0x1a2   : > { %3967 = vmatprep.mubr.msk.f32.mxu1 %vm1976_vm0, %v2011_v38  ;;  %v2751_v38 = vmul.f32 %v4533_v12, %v4847_v3 }
 0x1a5   : > { %3968 = vmatmul.mubr.msk.f32.gmra.mrb[6].mxu1 %vm1976_vm0, %v2012_v44  ;;  %v2753_v44 = vmul.f32 %v4553_v22, %v4857_v15 }
 0x1a6   : > { %3972 = vmatprep.mubr.msk.f32.mxu1 %vm1976_vm0, %v2290_v45  ;;  %v2746_v45 = vld [vmem:[#allocation4 + $0x49] sm:$0xff] }
 0x1a7   : > { %v2754_v50 = vmul.f32 %v4565_v26, %v2746_v45 }
 0x1a9   : > { %3973 = vmatmul.mubr.msk.f32.vlgmr.msra.gmra.mrb[0].mxu1 %vm1976_vm0, %v2291_v51  ;;  %v2902_v51 = vmul.f32 %v4415_v29, %v4791_v13  ;;  %v2905_v29 = vmul.f32 %v4457_v46, %v4810_v34  ;;  %v2906_v13 = vmul.f32 %v4462_v48, %v4813_v36  ;;  %v3056_v48 = vld [vmem:[#allocation4 + $0x50] sm:$0xff] }
 0x1aa   : > { %3985 = vmatpush3.msra.mxu1 %v3594_v31  ;;  %3975 = vmatprep.mubr.msk.f32.mxu1 %vm1976_vm0, %v2292_v52  ;;  %v2748_v31 = vmul.f32 %v4512_v4, %v4828_v14  ;;  %v2903_v52 = vmul.f32 %v4435_v37, %v4797_v30  ;;  %v2907_v37 = vmul.f32 %v4478_v54, %v4820_v42  ;;  %v2901_v30 = vld [vmem:[#allocation4 + $0x4f] sm:$0xff] }
 0x1ab   : > { %3998 = vmatprep.subr.mxu1 %v3603_v58  ;;  %v2909_v46 = vmul.f32 %v4497_v60, %v2901_v30  ;;  %v3204_v54 = vmul.f32 %v4502_v62, %v4828_v14  ;;  %v3206_v60 = vmul.f32 %v4517_v6, %v4840_v59  ;;  %v3208_v62 = vmul.f32 %v4533_v12, %v4850_v5 }
 0x1ac   : > { %v3210_v6 = vmul.f32 %v4553_v22, %v2746_v45 }
 0x1ad   : > { %3976 = vmatmul.mubr.msk.f32.gmra.mrb[2].mxu1 %vm1976_vm0, %v2293_v63  ;;  %v3639_v63 = vld [vmem:[%s5028_s4 + $0x40] sm:$0xff] }
 0x1ae   : > { %3978 = vmatprep.mubr.msk.f32.mxu1 %vm1976_vm0, %v2294_v0 }
 0x1b1   : > { %3979 = vmatmul.mubr.msk.f32.gmra.mrb[4].mxu1 %vm1976_vm0, %v2295_v8 }
 0x1b2   : > { %3981 = vmatprep.mubr.msk.f32.mxu1 %vm1976_vm0, %v2296_v9 }
 0x1b5   : > { %3982 = vmatmul.mubr.msk.f32.gmra.mrb[6].mxu1 %vm1976_vm0, %v2297_v16 }
 0x1b6   : > { %3986 = vmatprep.mubr.msk.f32.mxu1 %vm1976_vm0, %v2445_v17 }
 0x1b9   : > { %3987 = vmatmul.mubr.msk.f32.vlgmr.msra.gmra.mrb[0].mxu1 %vm1976_vm0, %v2446_v24 }
 0x1ba   : > { %3999 = vmatpush3.msra.mxu1 %v3603_v58  ;;  %3989 = vmatprep.mubr.msk.f32.mxu1 %vm1976_vm0, %v2447_v40  ;;  %v2904_v58 = vmul.f32 %v4440_v39, %v4803_v1  ;;  %v2908_v39 = vmul.f32 %v4483_v56, %v2444_v61  ;;  %v3205_v56 = vmul.f32 %v4512_v4, %v4834_v53 }
 0x1bb   : > { %4012 = vmatprep.subr.mxu1 %v3612_v49  ;;  %v3209_v4 = vmul.f32 %v4548_v19, %v4857_v15 }
 0x1bd   : > { %3990 = vmatmul.mubr.msk.f32.gmra.mrb[2].mxu1 %vm1976_vm0, %v2448_v2 }
 0x1be   : > { %3992 = vmatprep.mubr.msk.f32.mxu1 %vm1976_vm0, %v2449_v18 }
 0x1c1   : > { %3993 = vmatmul.mubr.msk.f32.gmra.mrb[4].mxu1 %vm1976_vm0, %v2450_v21 }
 0x1c2   : > { %3995 = vmatprep.mubr.msk.f32.mxu1 %vm1976_vm0, %v2451_v28 }
 0x1c5   : > { %3996 = vmatmul.mubr.msk.f32.gmra.mrb[6].mxu1 %vm1976_vm0, %v2452_v11 }
 0x1c6   : > { %4000 = vmatprep.mubr.msk.f32.mxu1 %vm1976_vm0, %v4756_v47  ;;  %v2599_v47 = vld [vmem:[#allocation4 + $0x48] sm:$0xff] }
 0x1c9   : > { %4001 = vmatmul.mubr.msk.f32.vlgmr.msra.gmra.mrb[0].mxu1 %vm1976_vm0, %v4764_v55 }
 0x1ca   : > { %4013 = vmatpush3.msra.mxu1 %v3612_v49  ;;  %4003 = vmatprep.mubr.msk.f32.mxu1 %vm1976_vm0, %v4769_v25 }
 0x1cb   : > { %4026 = vmatprep.subr.mxu1 %v3621_v20 }
 0x1cd   : > { %4004 = vmatmul.mubr.msk.f32.gmra.mrb[2].mxu1 %vm1976_vm0, %v4774_v27 }
 0x1ce   : > { %4006 = vmatprep.mubr.msk.f32.mxu1 %vm1976_vm0, %v4778_v35 }
 0x1d1   : > { %4007 = vmatmul.mubr.msk.f32.gmra.mrb[4].mxu1 %vm1976_vm0, %v4782_v57 }
 0x1d2   : > { %4009 = vmatprep.mubr.msk.f32.mxu1 %vm1976_vm0, %v4787_v7 }
 0x1d5   : > { %4010 = vmatmul.mubr.msk.f32.gmra.mrb[6].mxu1 %vm1976_vm0, %v2599_v47 }
 0x1d6   : > { %4014 = vmatprep.mubr.msk.f32.mxu1 %vm1976_vm0, %v2747_v23 }
 0x1d9   : > { %4015 = vmatmul.mubr.msk.f32.vlgmr.msra.gmra.mrb[0].mxu1 %vm1976_vm0, %v2748_v31 }
 0x1da   : > { %4027 = vmatpush3.msra.mxu1 %v3621_v20  ;;  %4017 = vmatprep.mubr.msk.f32.mxu1 %vm1976_vm0, %v2749_v32 }
 0x1db   : > { %4040 = vmatprep.subr.mxu1 %v3630_v33 }
 0x1dd   : > { %4018 = vmatmul.mubr.msk.f32.gmra.mrb[2].mxu1 %vm1976_vm0, %v2750_v41 }
 0x1de   : > { %4020 = vmatprep.mubr.msk.f32.mxu1 %vm1976_vm0, %v2751_v38 }
 0x1e1   : > { %4021 = vmatmul.mubr.msk.f32.gmra.mrb[4].mxu1 %vm1976_vm0, %v2752_v43 }
 0x1e2   : > { %4023 = vmatprep.mubr.msk.f32.mxu1 %vm1976_vm0, %v2753_v44 }
 0x1e5   : > { %4024 = vmatmul.mubr.msk.f32.gmra.mrb[6].mxu1 %vm1976_vm0, %v2754_v50 }
 0x1e6   : > { %4028 = vmatprep.mubr.msk.f32.mxu1 %vm1976_vm0, %v2902_v51 }
 0x1e9   : > { %4029 = vmatmul.mubr.msk.f32.vlgmr.msra.gmra.mrb[0].mxu1 %vm1976_vm0, %v2903_v52 }
 0x1ea   : > { %4041 = vmatpush3.msra.mxu1 %v3630_v33  ;;  %4031 = vmatprep.mubr.msk.f32.mxu1 %vm1976_vm0, %v2904_v58 }
 0x1eb   : > { %4054 = vmatprep.subr.mxu1 %v3639_v63 }
 0x1ed   : > { %4032 = vmatmul.mubr.msk.f32.gmra.mrb[2].mxu1 %vm1976_vm0, %v2905_v29 }
 0x1ee   : > { %4034 = vmatprep.mubr.msk.f32.mxu1 %vm1976_vm0, %v2906_v13 }
 0x1f1   : > { %4035 = vmatmul.mubr.msk.f32.gmra.mrb[4].mxu1 %vm1976_vm0, %v2907_v37 }
 0x1f2   : > { %4037 = vmatprep.mubr.msk.f32.mxu1 %vm1976_vm0, %v2908_v39 }
 0x1f5   : > { %4038 = vmatmul.mubr.msk.f32.gmra.mrb[6].mxu1 %vm1976_vm0, %v2909_v46 }
 0x1f6   : > { %4042 = vmatprep.mubr.msk.f32.mxu1 %vm1976_vm0, %v4764_v55  ;;  %v3207_v55 = vmul.f32 %v4528_v10, %v4847_v3  ;;  %v3648_v10 = vld [vmem:[%s5029_s5] ss:$0 sm:$0xff] }
 0x1f9   : > { %4043 = vmatmul.mubr.msk.f32.vlgmr.msra.gmra.mrb[0].mxu1 %vm1976_vm0, %v4769_v25  ;;  %v3203_v25 = vld [vmem:[#allocation4 + $0x51] sm:$0xff] }
 0x1fa   : > { %4055 = vmatpush3.msra.mxu1 %v3639_v63  ;;  %4045 = vmatprep.mubr.msk.f32.mxu1 %vm1976_vm0, %v4774_v27  ;;  %v3211_v27 = vmul.f32 %v4565_v26, %v3203_v25 }
 0x1fd   : > { %4046 = vmatmul.mubr.msk.f32.gmra.mrb[2].mxu1 %vm1976_vm0, %v4778_v35  ;;  %v3649_v35 = vld [vmem:[%s5030_s6] ss:$0 sm:$0xff] }
 0x1fe   : > { %4048 = vmatprep.mubr.msk.f32.mxu1 %vm1976_vm0, %v4782_v57 }
 0x201   : > { %4049 = vmatmul.mubr.msk.f32.gmra.mrb[4].mxu1 %vm1976_vm0, %v4787_v7 }
 0x202   : > { %4051 = vmatprep.mubr.msk.f32.mxu1 %vm1976_vm0, %v2599_v47 }
 0x205   : > { %4052 = vmatmul.mubr.msk.f32.gmra.mrb[6].mxu1 %vm1976_vm0, %v3056_v48 }
 0x206   : > { %4056 = vmatprep.mubr.msk.f32.mxu1 %vm1976_vm0, %v3204_v54 }
 0x209   : > { %4057 = vmatmul.mubr.msk.f32.vlgmr.msra.gmra.mrb[0].mxu1 %vm1976_vm0, %v3205_v56 }
 0x20a   : > { %4059 = vmatprep.mubr.msk.f32.mxu1 %vm1976_vm0, %v3206_v60 }
 0x20d   : > { %4060 = vmatmul.mubr.msk.f32.gmra.mrb[2].mxu1 %vm1976_vm0, %v3207_v55 }
 0x20e   : > { %4062 = vmatprep.mubr.msk.f32.mxu1 %vm1976_vm0, %v3208_v62 }
 0x211   : > { %4063 = vmatmul.mubr.msk.f32.gmra.mrb[4].mxu1 %vm1976_vm0, %v3209_v4 }
 0x212   : > { %4065 = vmatprep.mubr.msk.f32.mxu1 %vm1976_vm0, %v3210_v6 }
 0x215   : > { %4066 = vmatmul.mubr.msk.f32.gmra.mrb[6].mxu1 %vm1976_vm0, %v3211_v27 }
 0x2dc   : > { %v4058_v12 = vpop.f32.mrb[0].mxu1 }
 0x2dd   : > { %v3359_v19 = vmul.f32 %v4058_v12, %v3648_v10  ;;  %v3304_v22 = vpop.f32.mrb[1].mxu1 }
 0x2de   : > { %v3358_v57 = vmul.f32 %v3648_v10, %v3304_v22 }
 0x2df   : > { %v3374_v7 = vadd.f32 %v3649_v35, %v3359_v19 }
 0x2e0   : > { %v3373_v26 = vadd.f32 %v3649_v35, %v3358_v57  ;;  %v4061_v1 = vpop.f32.mrb[2].mxu1 }
 0x2e1   : > { %v3382_v34 = vmax.f32 %v3374_v7, 0.0  ;;  %v3361_v36 = vmul.f32 %v4061_v1, %v3648_v10  ;;  %v3314_v42 = vpop.f32.mrb[3].mxu1 }
 0x2e2   : > { %v3381_v14 = vmax.f32 %v3373_v26, 0.0  ;;  %v3360_v53 = vmul.f32 %v3648_v10, %v3314_v42 }
 0x2e3   : > { %3390 = vst.msk [vmem:[%s5003_s13 + $0x8] sm:$0xff] %vm1976_vm0, %v3382_v34  ;;  %v3376_v59 = vadd.f32 %v3649_v35, %v3361_v36 }
 0x2e4   : > { %3389 = vst.msk [vmem:[%s5003_s13] sm:$0xff] %vm1976_vm0, %v3381_v14  ;;  %v3375_v0 = vadd.f32 %v3649_v35, %v3360_v53  ;;  %v4064_v3 = vpop.f32.mrb[4].mxu1 }
 0x2e5   : > { %v3384_v5 = vmax.f32 %v3376_v59, 0.0  ;;  %v3363_v8 = vmul.f32 %v4064_v3, %v3648_v10  ;;  %v3324_v9 = vpop.f32.mrb[5].mxu1 }
 0x2e6   : > { %v3383_v15 = vmax.f32 %v3375_v0, 0.0  ;;  %v3362_v16 = vmul.f32 %v3648_v10, %v3324_v9 }
 0x2e7   : > { %3392 = vst.msk [vmem:[%s5003_s13 + $0x18] sm:$0xff] %vm1976_vm0, %v3384_v5  ;;  %v3378_v17 = vadd.f32 %v3649_v35, %v3363_v8 }
 0x2e8   : > { %3391 = vst.msk [vmem:[%s5003_s13 + $0x10] sm:$0xff] %vm1976_vm0, %v3383_v15  ;;  %v3377_v24 = vadd.f32 %v3649_v35, %v3362_v16  ;;  %v4067_v40 = vpop.f32.mrb[6].mxu1 }
 0x2e9   : > { %v3386_v49 = vmax.f32 %v3378_v17, 0.0  ;;  %v3365_v2 = vmul.f32 %v4067_v40, %v3648_v10  ;;  %v3334_v18 = vpop.f32.mrb[7].mxu1 }
 0x2ea   : > { %v3385_v21 = vmax.f32 %v3377_v24, 0.0  ;;  %v3364_v28 = vmul.f32 %v3648_v10, %v3334_v18 }
 0x2eb   : > { %3394 = vst.msk [vmem:[%s5003_s13 + $0x28] sm:$0xff] %vm1976_vm0, %v3386_v49  ;;  %v3380_v61 = vadd.f32 %v3649_v35, %v3365_v2 }
 0x2ec   : > { %3393 = vst.msk [vmem:[%s5003_s13 + $0x20] sm:$0xff] %vm1976_vm0, %v3385_v21  ;;  %v3379_v11 = vadd.f32 %v3649_v35, %v3364_v28 }
 0x2ed   : > { %v3388_v20 = vmax.f32 %v3380_v61, 0.0 }
 0x2ee   : > { %v3387_v47 = vmax.f32 %v3379_v11, 0.0 }
 0x2ef   : > { %3396 = vst.msk [vmem:[%s5003_s13 + $0x38] sm:$0xff] %vm1976_vm0, %v3388_v20 }
 0x2f0   : > { %3395 = vst.msk [vmem:[%s5003_s13 + $0x30] sm:$0xff] %vm1976_vm0, %v3387_v47 }
 0x2f1 PF: > { %s17_s24 = sadd.s32 1, %s4211_s24  }
 0x2f2   : > { %p14_p4 = scmp.ge.s32.totalorder %s17_s24, 4  }
 0x2f4   :  { %16 = sbr.rel (!%p14_p4) target bundleno = 1 (0x1), region = 109 }

</bundles_post_ra>
